<compile_context>
chip_gen: v5e
topology: v5e:2x2
jax: 0.10.0
libtpu: 0.0.40
codegen_flags: <defaults>
</compile_context>

<pallas_src>
import math

import jax
import jax.numpy as jnp
from jax.experimental import pallas as pl
from jax.experimental.pallas import tpu as pltpu

_COLS = 1024            # lane-dense last dim: 8 sublanes x 128 lanes per f32 vreg
_MAX_BLK_ROWS = 1024    # (1024, 1024) f32 tile = 4 MiB
_VMEM_LIMIT = 40 << 20  # > 16 MiB double-buffered in+out; safe on v5e/v6e/v7x
_SMALL_N = 1 << 16      # below this, pallas_call fixed cost dominates -> plain jnp


def _poly_kernel(coef_ref, x_ref, y_ref):
    # coef_ref: SMEM f32[4] -> a, b, c, d (scalar-prefetched)
    # x_ref   : VMEM f32[blk_r, 1024]
    # y_ref   : VMEM f32[blk_r, 1024]
    a = coef_ref[0]
    b = coef_ref[1]
    c = coef_ref[2]
    d = coef_ref[3]
    x = x_ref[...]
    # Horner form: a + x*(b + x*(c + x*d)) == a + b*x + c*x^2 + d*x^3
    y_ref[...] = a + x * (b + x * (c + x * d))


def _horner_jnp(x, coefs):
    a, b, c, d = coefs[0], coefs[1], coefs[2], coefs[3]
    return a + x * (b + x * (c + x * d))


def _poly_pallas_2d(x2d, coefs):
    """Run the kernel over a (rows, 1024) f32 slab.  rows need not divide blk_r."""
    rows = x2d.shape[0]
    # >= 2 grid steps so the "parallel" axis can shard across v7x's two TCs.
    half_rows = -(-rows // 2)
    blk_r = min(_MAX_BLK_ROWS, max(8, -(-half_rows // 8) * 8))
    grid = (pl.cdiv(rows, blk_r),)   # ragged last tile is masked by Pallas

    return pl.pallas_call(
        _poly_kernel,
        out_shape=jax.ShapeDtypeStruct((rows, _COLS), jnp.float32),
        grid_spec=pltpu.PrefetchScalarGridSpec(
            num_scalar_prefetch=1,                 # coefs land in SMEM
            grid=grid,
            in_specs=[pl.BlockSpec((blk_r, _COLS), lambda i, cref: (i, 0))],
            out_specs=pl.BlockSpec((blk_r, _COLS), lambda i, cref: (i, 0)),
        ),
        compiler_params=pltpu.CompilerParams(
            dimension_semantics=("parallel",),
            vmem_limit_bytes=_VMEM_LIMIT,
        ),
    )(coefs, x2d)


def fitting_polynomial_forward(x, a, b, c, d):
    """Evaluate y = a + b*x + c*x^2 + d*x^3 (same result/shape as the torch module).

    x: float32 array (any shape); a, b, c, d: scalar parameters.
    """
    x = jnp.asarray(x, jnp.float32)   # NOTE: inputs are evaluated in float32
    orig_shape = x.shape
    n = int(x.size)

    coefs = jnp.stack(
        [jnp.asarray(a), jnp.asarray(b), jnp.asarray(c), jnp.asarray(d)]
    ).astype(jnp.float32)

    if n == 0:
        return jnp.zeros(orig_shape, jnp.float32)

    if n < _SMALL_N:
        # Small-N fast path (covers the module's actual N=100 use case).
        return _horner_jnp(x, coefs)

    xf = x.reshape(-1)                     # free bitcast for contiguous x
    n_main = (n // _COLS) * _COLS          # lane-aligned prefix

    if n_main == n:
        # Fully aligned: zero wrapper copies, pure Pallas path.
        y2d = _poly_pallas_2d(xf.reshape(n // _COLS, _COLS), coefs)
        return y2d.reshape(orig_shape)

    # Unaligned: Pallas on the aligned prefix + tiny (<1024 elem) jnp tail
    # epilogue, instead of padding / slicing the whole array.
    y_main = _poly_pallas_2d(
        xf[:n_main].reshape(n_main // _COLS, _COLS), coefs
    ).reshape(-1)
    y_tail = _horner_jnp(xf[n_main:], coefs)
    return jnp.concatenate([y_main, y_tail]).reshape(orig_shape)


if __name__ == "__main__":
    # Deterministic "parameters" (the module's __init__ uses torch.randn(()) x4).
    key = jax.random.PRNGKey(0)
    ka, kb, kc, kd = jax.random.split(key, 4)
    a = jax.random.normal(ka, (), jnp.float32)
    b = jax.random.normal(kb, (), jnp.float32)
    c = jax.random.normal(kc, (), jnp.float32)
    d = jax.random.normal(kd, (), jnp.float32)

    def ref(x):
        return a + b * x + c * x**2 + d * x**3

    # 1) The module's actual use case: x = linspace(-pi, pi, 100)  (jnp fast path).
    x_small = jnp.linspace(-math.pi, math.pi, 100, dtype=jnp.float32)
    y_small = jax.block_until_ready(fitting_polynomial_forward(x_small, a, b, c, d))
    assert y_small.shape == x_small.shape
    assert jnp.allclose(y_small, ref(x_small), atol=1e-5, rtol=1e-5), "mismatch (small)"

    # 2) Lane-aligned large input -> pure Pallas path, multi-tile grid.
    n_aligned = 256 * 1024
    x_al = jnp.linspace(-math.pi, math.pi, n_aligned, dtype=jnp.float32)
    y_al = jax.block_until_ready(fitting_polynomial_forward(x_al, a, b, c, d))
    assert y_al.shape == x_al.shape
    assert jnp.allclose(y_al, ref(x_al), atol=1e-5, rtol=1e-5), "mismatch (aligned)"

    # 3) Unaligned large input -> Pallas prefix + tiny jnp tail epilogue.
    n_unaligned = 200_000
    x_un = jnp.linspace(-math.pi, math.pi, n_unaligned, dtype=jnp.float32)
    y_un = jax.block_until_ready(fitting_polynomial_forward(x_un, a, b, c, d))
    assert y_un.shape == x_un.shape
    assert jnp.allclose(y_un, ref(x_un), atol=1e-5, rtol=1e-5), "mismatch (unaligned)"

    print("KERNEL_OK")
</pallas_src>

<mosaic_0001>
module attributes {stable_mosaic.version = 11 : i64} {
  func.func @_poly_kernel(%arg0: i32, %arg1: memref<4xf32, #tpu.memory_space<smem>>, %arg2: memref<128x1024xf32, #tpu.memory_space<vmem>>, %arg3: memref<128x1024xf32, #tpu.memory_space<vmem>>) attributes {dimension_semantics = [#tpu.dimension_semantics<parallel>], iteration_bounds = array<i64: 2>, scalar_prefetch = 1 : i64, scratch_operands = 0 : i64, tpu.core_type = #tpu.core_type<tc>, window_params = [{transform_indices = @transform_0, window_bounds = array<i64: 128, 1024>}, {transform_indices = @transform_1, window_bounds = array<i64: 128, 1024>}]} {
    %c0 = arith.constant 0 : index
    %0 = memref.load %arg1[%c0] : memref<4xf32, #tpu.memory_space<smem>>
    %c1 = arith.constant 1 : index
    %1 = memref.load %arg1[%c1] : memref<4xf32, #tpu.memory_space<smem>>
    %c2 = arith.constant 2 : index
    %2 = memref.load %arg1[%c2] : memref<4xf32, #tpu.memory_space<smem>>
    %c3 = arith.constant 3 : index
    %3 = memref.load %arg1[%c3] : memref<4xf32, #tpu.memory_space<smem>>
    %c0_0 = arith.constant 0 : index
    %c0_1 = arith.constant 0 : index
    %4 = vector.load %arg2[%c0_0, %c0_1] : memref<128x1024xf32, #tpu.memory_space<vmem>>, vector<128x1024xf32>
    %5 = vector.broadcast %3 : f32 to vector<128x1024xf32>
    %6 = arith.mulf %4, %5 : vector<128x1024xf32>
    %7 = vector.broadcast %2 : f32 to vector<128x1024xf32>
    %8 = arith.addf %7, %6 : vector<128x1024xf32>
    %9 = arith.mulf %4, %8 : vector<128x1024xf32>
    %10 = vector.broadcast %1 : f32 to vector<128x1024xf32>
    %11 = arith.addf %10, %9 : vector<128x1024xf32>
    %12 = arith.mulf %4, %11 : vector<128x1024xf32>
    %13 = vector.broadcast %0 : f32 to vector<128x1024xf32>
    %14 = arith.addf %13, %12 : vector<128x1024xf32>
    %c0_2 = arith.constant 0 : index
    %c0_3 = arith.constant 0 : index
    %15 = vector.load %arg3[%c0_2, %c0_3] : memref<128x1024xf32, #tpu.memory_space<vmem>>, vector<128x1024xf32>
    tpu.vector_store %arg3[%c0_2, %c0_3], %14 {strides = array<i32>} : memref<128x1024xf32, #tpu.memory_space<vmem>>, vector<128x1024xf32>,
    return
  }
  func.func @transform_0(%arg0: i32, %arg1: memref<4xf32, #tpu.memory_space<smem>>) -> (i32, i32) {
    %c0_i32 = arith.constant 0 : i32
    %c0_i32_0 = arith.constant 0 : i32
    return %arg0, %c0_i32 : i32, i32
  }
  func.func @transform_1(%arg0: i32, %arg1: memref<4xf32, #tpu.memory_space<smem>>) -> (i32, i32) {
    %c0_i32 = arith.constant 0 : i32
    %c0_i32_0 = arith.constant 0 : i32
    return %arg0, %c0_i32 : i32, i32
  }
}

</mosaic_0001>

<bundles_post_ra>
// kernel: tpu_custom_call.1
= control target key start
LH: loop header
LB: loop body
LE: loop exit
PB: predicated region body
PF: predicated region fallthrough
CT: control target
= control target key end

     0   :  { %s1457_s12 = smov [#allocation3]   ;;  %s2392_s0 = inlined_call_operand.hbm [shape: f32[4], index: 0, kind: input, shape index: {}]   ;;  %s2393_s1 = inlined_call_operand.hbm [shape: f32[256,1024], index: 1, kind: input, shape index: {}]   ;;  %s2394_s2 = inlined_call_operand.hbm [shape: f32[256,1024], index: 2, kind: output, shape index: {}]  }
   0x1   :  { %s8_s11 = sshll.u32 %s2392_s0, 4  ;;  %s9_s11 = int_to_ptr.hbm [resolvable:$true] %s8_s11 }
   0x2   :  { %11 = dma.hbm_to_smem %s9_s11, 16, %s1457_s12, [#allocation2] }
   0x3   :  { %1431 = dma.done.wait [#allocation2], 16 }
   0x4   :  { %1432 = vsyncadd [#allocation2], 4294967280 }
   0x5   :  { %14 = sfence }
   0x6   :  { %15 = vsyncpa [#allocation5], 0 }
   0x7   :  { %17 = vsyncpa [#allocation5 + $0x1], 0 }
   0x8   :  { %18 = vsyncpa [#allocation6], 0 }
   0x9   :  { %20 = vsyncpa [#allocation6 + $0x1], 0  ;;  %s1480_s13 = smov 0   ;;  %s1482_s14 = smov 0  }
   0xa   :  { %s1484_s15 = smov 0   ;;  %s1486_s16 = smov 0  }
   0xb LB: > { %s1501_s0 = sadd.s32 4294967295, %s1455_s16   ;;  %s1271_s17 = sadd.s32 4294967294, %s1455_s16   ;;  %s1455_s16 = sphi %s1486_s16, %s2404_s16   ;;  %s1451_s15 = sphi %s1484_s15, %s2403_s15   ;;  %s1447_s14 = sphi %s1482_s14, %s2402_s14   ;;  %s1443_s13 = sphi %s1480_s13, %s2401_s13  }
   0xc   : > { %s1505_s18 = sadd.s32 1, %s1455_s16   ;;  %s33_s19 = sadd.s32 1, %s1451_s15 }
   0xd   : > { %s30_s20 = ssub.s32 %s1455_s16, %s1505_s18  ;;  %p40_p0 = scmp.ne.s32.totalorder %s1451_s15, %s1447_s14 }
   0xe   : > { %p31_p1 = scmp.eq.s32.totalorder %s30_s20, 0  ;;  %p41_p2 = scmp.eq.s32.totalorder %s1455_s16, 0 }
   0xf   : > { %p46_p3 = scmp.ne.s32.totalorder %s1447_s14, %s1443_s13  ;;  %p47_p4 = scmp.eq.s32.totalorder %s1501_s0, 0 }
  0x10   : > { %s1517_s21 = scalar_select %p31_p1, %s1451_s15, %s33_s19  }
  0x11   : > { %p1519_p5 = por %p41_p2, %p40_p0  ;;  %p1523_p6 = por %p47_p4, %p46_p3 }
  0x12   : > { %p70_p7 = scmp.eq.s32.totalorder %s1501_s0, 1  ;;  %p76_p8 = scmp.eq.s32.totalorder %s1271_s17, 1 }
  0x13   : > { %p1306_p10 = scmp.lt.s32.totalorder %s1455_s16, 2  ;;  %s96_s26 = sand.u32 1, %s1451_s15  }
  0x14   : > { %p1530_p11 = por %p70_p7, %p40_p0  ;;  %p1534_p12 = por %p76_p8, %p46_p3 }
  0x15   : > { %s1291_s27 = sshll.u32 %s1455_s16, 10  ;;  %s1274_s28 = sshll.u32 %s96_s26, 10 }
  0x16   : > { %s106_s3 = scalar_lea.hbm %s2393_s1, %s1291_s27  ;;  %s100_s5 = scalar_lea.vmem [#allocation4], %s1274_s28 }
  0x17   : > { %s107_s4 = sshll.u32 %s106_s3, 4  ;;  %s109_s6 = sshll.u32 %s100_s5, 4  ;;  %s108_s4 = int_to_ptr.hbm [resolvable:$true] %s107_s4  ;;  %s110_s6 = int_to_ptr.vmem [resolvable:$true] %s109_s6 }
  0x18   : > { %p1545_p13 = pnand %p1306_p10, %p1519_p5  ;;  %p1278_p0 = scmp.ge.s32.totalorder %s1455_s16, 1 }
  0x19   : > { %p117_p1 = scmp.lt.s32.totalorder %s1455_s16, 3  ;;  %s97_s8 = scalar_lea.sflag [#allocation5], %s96_s26 }
  0x1a   : > { %s1357_s9 = sshra.s32 %s108_s4, 4  ;;  %p1361_p3 = pneg %p1545_p13  ;;  %s1358_s9 = int_to_ptr.hbm [resolvable:$true] %s1357_s9 }
  0x1b   : > { %s1359_s10 = scalar_lea.hbm %s1358_s9, 1024  ;;  %s1364_s17 = scalar_lea.hbm %s2393_s1, 2048 }
  0x1c   : > { %p1360_p2 = scmp.ne.s32.totalorder %s1358_s9, %s1359_s10  ;;  %p1365_p5 = scmp.lt.s32.totalorder %s1358_s9, %s2393_s1 }
  0x1d   : > { %p1366_p8 = scmp.lt.s32.totalorder %s1364_s17, %s1359_s10 }
  0x1e   : > { %p1362_p4 = pnand %p1361_p3, %p1360_p2 }
  0x1f   : > { %p1367_p10 = por %p1366_p8, %p1365_p5 }
  0x20   : > { %p1363_p7 = pneg %p1362_p4 }
  0x22   : > { %p1368_p9 = pnand %p1367_p10, %p1363_p7 }
  0x24   : > { %1371 = shalt.err (!%p1368_p9)
}
  0x25   : > { %s1458_s22 = smov 1024   ;;  %s1459_s26 = smov 64  }
  0x26   : > { %1301 = dma.hbm_to_vmem [thread:$0]  (!%p1545_p13), %s108_s4, 16384, %s110_s6, %s97_s8, %s1458_s22, %s1458_s22, %s1459_s26  }
  0x27   : > { %p118_p2 = pnand %p1278_p0, %p117_p1 }
  0x28   : > { %s1566_s27 = sand.u32 (!%p118_p2), 1, %s1447_s14  }
  0x29   : > { %121 = sbr.rel (%p118_p2) target bundleno = 260 (0x104), region = 24  ;;  %s1279_s28 = sshll.u32 (!%p118_p2), %s1566_s27, 10 }
  0x2a   : > { %s124_s29 = scalar_lea.sflag (!%p118_p2), [#allocation5], %s1566_s27  ;;  %s1572_s30 = scalar_lea.vmem (!%p118_p2), [#allocation4], %s1279_s28 }
  0x2e   : > { %1434 = dma.done.wait (%p1523_p6), %s124_s29, 16384  }
  0x2f   : > { %1436 = vsyncadd (%p1523_p6), %s124_s29, 4294950912  ;;  %s149_s3 = sld [smem:[#allocation3]]  ;;  %v153_v0 = vld [vmem:[%s1572_s30] sm:$0xff]  ;;  %v154_v1 = vld [vmem:[%s1572_s30 + $0x8] sm:$0xff]  ;;  %s1636_s23 = scalar_lea.vmem [#allocation7], %s1279_s28 }
  0x30   : > { %s1281_s4 = sld [smem:[#allocation3 + $0x1]]  ;;  %v155_v2 = vld [vmem:[%s1572_s30 + $0x10] sm:$0xff]  ;;  %v156_v3 = vld [vmem:[%s1572_s30 + $0x18] sm:$0xff]  ;;  %v157_v4 = vld [vmem:[%s1572_s30 + $0x20] sm:$0xff]  ;;  %s1293_s7 = sshll.u32 %s1501_s0, 10 }
  0x31   : > { %s1282_s5 = sld [smem:[#allocation3 + $0x2]]  ;;  %v158_v5 = vld [vmem:[%s1572_s30 + $0x28] sm:$0xff]  ;;  %v159_v6 = vld [vmem:[%s1572_s30 + $0x30] sm:$0xff]  ;;  %v160_v7 = vld [vmem:[%s1572_s30 + $0x38] sm:$0xff]  ;;  %s1194_s9 = scalar_lea.hbm %s2394_s2, %s1293_s7 }
  0x32   : > { %s1283_s6 = sld [smem:[#allocation3 + $0x3]]  ;;  %v161_v48 = vld [vmem:[%s1572_s30 + $0x40] sm:$0xff]  ;;  %v162_v49 = vld [vmem:[%s1572_s30 + $0x48] sm:$0xff]  ;;  %v163_v54 = vld [vmem:[%s1572_s30 + $0x50] sm:$0xff]  ;;  %s1195_s10 = sshll.u32 %s1636_s23, 4  ;;  %s1196_s10 = int_to_ptr.vmem [resolvable:$true] %s1195_s10 }
  0x33   : > { %v164_v55 = vld [vmem:[%s1572_s30 + $0x58] sm:$0xff]  ;;  %v165_v56 = vld [vmem:[%s1572_s30 + $0x60] sm:$0xff]  ;;  %v166_v61 = vld [vmem:[%s1572_s30 + $0x68] sm:$0xff]  ;;  %s1197_s11 = sshll.u32 %s1194_s9, 4  ;;  %s1182_s12 = scalar_lea.sflag [#allocation6], %s1566_s27  ;;  %s1198_s11 = int_to_ptr.hbm [resolvable:$true] %s1197_s11 }
  0x34   : > { %v167_v62 = vld [vmem:[%s1572_s30 + $0x70] sm:$0xff]  ;;  %v168_v63 = vld [vmem:[%s1572_s30 + $0x78] sm:$0xff]  ;;  %s1401_s17 = sshra.s32 %s1198_s11, 4  ;;  %s1407_s26 = scalar_lea.hbm %s2394_s2, 2048  ;;  %s1402_s17 = int_to_ptr.hbm [resolvable:$true] %s1401_s17 }
  0x35   : > { %v1592_v11 = vstv %s149_s3  ;;  %s1403_s19 = scalar_lea.hbm %s1402_s17, 1024  ;;  %p1408_p0 = scmp.lt.s32.totalorder %s1402_s17, %s2394_s2 }
  0x36   : > { %v1590_v10 = vstv %s1281_s4  ;;  %p1404_p6 = scmp.ne.s32.totalorder %s1402_s17, %s1403_s19  ;;  %p1409_p1 = scmp.lt.s32.totalorder %s1407_s26, %s1403_s19 }
  0x37   : > { %v1588_v9 = vstv %s1282_s5 }
  0x38   : > { %v1586_v8 = vstv %s1283_s6  ;;  %p1405_p9 = pnand %p1404_p6, %p1530_p11  ;;  %p1410_p3 = por %p1409_p1, %p1408_p0 }
  0x39   : > { %v282_v12 = vmul.f32 %v1586_v8, %v153_v0  ;;  %v283_v13 = vmul.f32 %v1586_v8, %v154_v1  ;;  %v284_v14 = vmul.f32 %v1586_v8, %v155_v2  ;;  %v285_v15 = vmul.f32 %v1586_v8, %v156_v3 }
  0x3a   : > { %v286_v16 = vmul.f32 %v1586_v8, %v157_v4  ;;  %v287_v17 = vmul.f32 %v1586_v8, %v158_v5  ;;  %v288_v18 = vmul.f32 %v1586_v8, %v159_v6  ;;  %v289_v19 = vmul.f32 %v1586_v8, %v160_v7  ;;  %p1406_p13 = pneg %p1405_p9 }
  0x3b   : > { %v411_v20 = vadd.f32 %v1588_v9, %v282_v12  ;;  %v412_v21 = vadd.f32 %v1588_v9, %v283_v13  ;;  %v413_v22 = vadd.f32 %v1588_v9, %v284_v14  ;;  %v414_v23 = vadd.f32 %v1588_v9, %v285_v15 }
  0x3c   : > { %v415_v24 = vadd.f32 %v1588_v9, %v286_v16  ;;  %v416_v25 = vadd.f32 %v1588_v9, %v287_v17  ;;  %v417_v26 = vadd.f32 %v1588_v9, %v288_v18  ;;  %v418_v27 = vadd.f32 %v1588_v9, %v289_v19  ;;  %p1411_p4 = pnand %p1410_p3, %p1406_p13 }
  0x3d   : > { %v539_v28 = vmul.f32 %v411_v20, %v153_v0  ;;  %v540_v29 = vmul.f32 %v412_v21, %v154_v1  ;;  %v541_v30 = vmul.f32 %v413_v22, %v155_v2  ;;  %v542_v31 = vmul.f32 %v414_v23, %v156_v3 }
  0x3e   : > { %v543_v32 = vmul.f32 %v415_v24, %v157_v4  ;;  %v544_v33 = vmul.f32 %v416_v25, %v158_v5  ;;  %v545_v34 = vmul.f32 %v417_v26, %v159_v6  ;;  %v546_v35 = vmul.f32 %v418_v27, %v160_v7 }
  0x3f   : > { %v668_v36 = vadd.f32 %v1590_v10, %v539_v28  ;;  %v669_v37 = vadd.f32 %v1590_v10, %v540_v29  ;;  %v670_v38 = vadd.f32 %v1590_v10, %v541_v30  ;;  %v671_v39 = vadd.f32 %v1590_v10, %v542_v31 }
  0x40   : > { %v672_v40 = vadd.f32 %v1590_v10, %v543_v32  ;;  %v673_v41 = vadd.f32 %v1590_v10, %v544_v33  ;;  %v674_v42 = vadd.f32 %v1590_v10, %v545_v34  ;;  %v675_v43 = vadd.f32 %v1590_v10, %v546_v35 }
  0x41   : > { %v796_v44 = vmul.f32 %v668_v36, %v153_v0  ;;  %v797_v45 = vmul.f32 %v669_v37, %v154_v1  ;;  %v798_v46 = vmul.f32 %v670_v38, %v155_v2  ;;  %v799_v47 = vmul.f32 %v671_v39, %v156_v3 }
  0x42   : > { %v800_v50 = vmul.f32 %v672_v40, %v157_v4  ;;  %v801_v51 = vmul.f32 %v673_v41, %v158_v5  ;;  %v802_v52 = vmul.f32 %v674_v42, %v159_v6  ;;  %v803_v53 = vmul.f32 %v675_v43, %v160_v7 }
  0x43   : > { %v925_v57 = vadd.f32 %v1592_v11, %v796_v44  ;;  %v926_v58 = vadd.f32 %v1592_v11, %v797_v45  ;;  %v927_v59 = vadd.f32 %v1592_v11, %v798_v46  ;;  %v928_v60 = vadd.f32 %v1592_v11, %v799_v47  ;;  %v169_v44 = vld [vmem:[%s1572_s30 + $0x80] sm:$0xff]  ;;  %v170_v45 = vld [vmem:[%s1572_s30 + $0x88] sm:$0xff] }
  0x44   : > { %v929_v0 = vadd.f32 %v1592_v11, %v800_v50  ;;  %v930_v1 = vadd.f32 %v1592_v11, %v801_v51  ;;  %v931_v2 = vadd.f32 %v1592_v11, %v802_v52  ;;  %v932_v3 = vadd.f32 %v1592_v11, %v803_v53  ;;  %v171_v52 = vld [vmem:[%s1572_s30 + $0x90] sm:$0xff]  ;;  %v172_v53 = vld [vmem:[%s1572_s30 + $0x98] sm:$0xff] }
  0x45   : > { %1053 = vst [vmem:[%s1636_s23] sm:$0xff] %v925_v57  ;;  %v290_v4 = vmul.f32 %v1586_v8, %v161_v48  ;;  %v291_v5 = vmul.f32 %v1586_v8, %v162_v49  ;;  %v292_v6 = vmul.f32 %v1586_v8, %v163_v54  ;;  %v293_v7 = vmul.f32 %v1586_v8, %v164_v55  ;;  %v173_v57 = vld [vmem:[%s1572_s30 + $0xa0] sm:$0xff] }
  0x46   : > { %1054 = vst [vmem:[%s1636_s23 + $0x8] sm:$0xff] %v926_v58  ;;  %v294_v12 = vmul.f32 %v1586_v8, %v165_v56  ;;  %v295_v13 = vmul.f32 %v1586_v8, %v166_v61  ;;  %v296_v14 = vmul.f32 %v1586_v8, %v167_v62  ;;  %v297_v15 = vmul.f32 %v1586_v8, %v168_v63 }
  0x47   : > { %1055 = vst [vmem:[%s1636_s23 + $0x10] sm:$0xff] %v927_v59  ;;  %v419_v16 = vadd.f32 %v1588_v9, %v290_v4  ;;  %v420_v17 = vadd.f32 %v1588_v9, %v291_v5  ;;  %v421_v18 = vadd.f32 %v1588_v9, %v292_v6  ;;  %v422_v19 = vadd.f32 %v1588_v9, %v293_v7  ;;  %v175_v59 = vld [vmem:[%s1572_s30 + $0xb0] sm:$0xff] }
  0x48   : > { %1056 = vst [vmem:[%s1636_s23 + $0x18] sm:$0xff] %v928_v60  ;;  %v423_v20 = vadd.f32 %v1588_v9, %v294_v12  ;;  %v424_v21 = vadd.f32 %v1588_v9, %v295_v13  ;;  %v425_v22 = vadd.f32 %v1588_v9, %v296_v14  ;;  %v426_v23 = vadd.f32 %v1588_v9, %v297_v15 }
  0x49   : > { %1057 = vst [vmem:[%s1636_s23 + $0x20] sm:$0xff] %v929_v0  ;;  %v547_v24 = vmul.f32 %v419_v16, %v161_v48  ;;  %v548_v25 = vmul.f32 %v420_v17, %v162_v49  ;;  %v549_v26 = vmul.f32 %v421_v18, %v163_v54  ;;  %v550_v27 = vmul.f32 %v422_v19, %v164_v55 }
  0x4a   : > { %1058 = vst [vmem:[%s1636_s23 + $0x28] sm:$0xff] %v930_v1  ;;  %v551_v28 = vmul.f32 %v423_v20, %v165_v56  ;;  %v552_v29 = vmul.f32 %v424_v21, %v166_v61  ;;  %v553_v30 = vmul.f32 %v425_v22, %v167_v62  ;;  %v554_v31 = vmul.f32 %v426_v23, %v168_v63 }
  0x4b   : > { %1059 = vst [vmem:[%s1636_s23 + $0x30] sm:$0xff] %v931_v2  ;;  %v676_v32 = vadd.f32 %v1590_v10, %v547_v24  ;;  %v677_v33 = vadd.f32 %v1590_v10, %v548_v25  ;;  %v678_v34 = vadd.f32 %v1590_v10, %v549_v26  ;;  %v679_v35 = vadd.f32 %v1590_v10, %v550_v27 }
  0x4c   : > { %1060 = vst [vmem:[%s1636_s23 + $0x38] sm:$0xff] %v932_v3  ;;  %v680_v36 = vadd.f32 %v1590_v10, %v551_v28  ;;  %v681_v37 = vadd.f32 %v1590_v10, %v552_v29  ;;  %v682_v38 = vadd.f32 %v1590_v10, %v553_v30  ;;  %v683_v39 = vadd.f32 %v1590_v10, %v554_v31 }
  0x4d   : > { %v804_v40 = vmul.f32 %v676_v32, %v161_v48  ;;  %v805_v41 = vmul.f32 %v677_v33, %v162_v49  ;;  %v806_v42 = vmul.f32 %v678_v34, %v163_v54  ;;  %v807_v43 = vmul.f32 %v679_v35, %v164_v55  ;;  %v174_v55 = vld [vmem:[%s1572_s30 + $0xa8] sm:$0xff] }
  0x4e   : > { %v808_v46 = vmul.f32 %v680_v36, %v165_v56  ;;  %v809_v47 = vmul.f32 %v681_v37, %v166_v61  ;;  %v810_v50 = vmul.f32 %v682_v38, %v167_v62  ;;  %v811_v51 = vmul.f32 %v683_v39, %v168_v63  ;;  %v176_v56 = vld [vmem:[%s1572_s30 + $0xb8] sm:$0xff] }
  0x4f   : > { %v933_v58 = vadd.f32 %v1592_v11, %v804_v40  ;;  %v934_v48 = vadd.f32 %v1592_v11, %v805_v41  ;;  %v935_v49 = vadd.f32 %v1592_v11, %v806_v42  ;;  %v936_v54 = vadd.f32 %v1592_v11, %v807_v43  ;;  %v177_v40 = vld [vmem:[%s1572_s30 + $0xc0] sm:$0xff]  ;;  %v178_v41 = vld [vmem:[%s1572_s30 + $0xc8] sm:$0xff] }
  0x50   : > { %v937_v60 = vadd.f32 %v1592_v11, %v808_v46  ;;  %v938_v61 = vadd.f32 %v1592_v11, %v809_v47  ;;  %v939_v62 = vadd.f32 %v1592_v11, %v810_v50  ;;  %v940_v63 = vadd.f32 %v1592_v11, %v811_v51  ;;  %v179_v50 = vld [vmem:[%s1572_s30 + $0xd0] sm:$0xff]  ;;  %v180_v51 = vld [vmem:[%s1572_s30 + $0xd8] sm:$0xff] }
  0x51   : > { %1061 = vst [vmem:[%s1636_s23 + $0x40] sm:$0xff] %v933_v58  ;;  %v298_v0 = vmul.f32 %v1586_v8, %v169_v44  ;;  %v299_v1 = vmul.f32 %v1586_v8, %v170_v45  ;;  %v300_v2 = vmul.f32 %v1586_v8, %v171_v52  ;;  %v301_v3 = vmul.f32 %v1586_v8, %v172_v53  ;;  %v181_v58 = vld [vmem:[%s1572_s30 + $0xe0] sm:$0xff] }
  0x52   : > { %1062 = vst [vmem:[%s1636_s23 + $0x48] sm:$0xff] %v934_v48  ;;  %v302_v4 = vmul.f32 %v1586_v8, %v173_v57  ;;  %v303_v5 = vmul.f32 %v1586_v8, %v174_v55  ;;  %v304_v6 = vmul.f32 %v1586_v8, %v175_v59  ;;  %v305_v7 = vmul.f32 %v1586_v8, %v176_v56 }
  0x53   : > { %1063 = vst [vmem:[%s1636_s23 + $0x50] sm:$0xff] %v935_v49  ;;  %v427_v12 = vadd.f32 %v1588_v9, %v298_v0  ;;  %v428_v13 = vadd.f32 %v1588_v9, %v299_v1  ;;  %v429_v14 = vadd.f32 %v1588_v9, %v300_v2  ;;  %v430_v15 = vadd.f32 %v1588_v9, %v301_v3  ;;  %v183_v49 = vld [vmem:[%s1572_s30 + $0xf0] sm:$0xff] }
  0x54   : > { %1064 = vst [vmem:[%s1636_s23 + $0x58] sm:$0xff] %v936_v54  ;;  %v431_v16 = vadd.f32 %v1588_v9, %v302_v4  ;;  %v432_v17 = vadd.f32 %v1588_v9, %v303_v5  ;;  %v433_v18 = vadd.f32 %v1588_v9, %v304_v6  ;;  %v434_v19 = vadd.f32 %v1588_v9, %v305_v7 }
  0x55   : > { %1065 = vst [vmem:[%s1636_s23 + $0x60] sm:$0xff] %v937_v60  ;;  %v555_v20 = vmul.f32 %v427_v12, %v169_v44  ;;  %v556_v21 = vmul.f32 %v428_v13, %v170_v45  ;;  %v557_v22 = vmul.f32 %v429_v14, %v171_v52  ;;  %v558_v23 = vmul.f32 %v430_v15, %v172_v53 }
  0x56   : > { %1066 = vst [vmem:[%s1636_s23 + $0x68] sm:$0xff] %v938_v61  ;;  %v559_v24 = vmul.f32 %v431_v16, %v173_v57  ;;  %v560_v25 = vmul.f32 %v432_v17, %v174_v55  ;;  %v561_v26 = vmul.f32 %v433_v18, %v175_v59  ;;  %v562_v27 = vmul.f32 %v434_v19, %v176_v56 }
  0x57   : > { %1067 = vst [vmem:[%s1636_s23 + $0x70] sm:$0xff] %v939_v62  ;;  %v684_v28 = vadd.f32 %v1590_v10, %v555_v20  ;;  %v685_v29 = vadd.f32 %v1590_v10, %v556_v21  ;;  %v686_v30 = vadd.f32 %v1590_v10, %v557_v22  ;;  %v687_v31 = vadd.f32 %v1590_v10, %v558_v23 }
  0x58   : > { %1068 = vst [vmem:[%s1636_s23 + $0x78] sm:$0xff] %v940_v63  ;;  %v688_v32 = vadd.f32 %v1590_v10, %v559_v24  ;;  %v689_v33 = vadd.f32 %v1590_v10, %v560_v25  ;;  %v690_v34 = vadd.f32 %v1590_v10, %v561_v26  ;;  %v691_v35 = vadd.f32 %v1590_v10, %v562_v27 }
  0x59   : > { %v812_v36 = vmul.f32 %v684_v28, %v169_v44  ;;  %v813_v37 = vmul.f32 %v685_v29, %v170_v45  ;;  %v814_v38 = vmul.f32 %v686_v30, %v171_v52  ;;  %v815_v39 = vmul.f32 %v687_v31, %v172_v53  ;;  %v182_v53 = vld [vmem:[%s1572_s30 + $0xe8] sm:$0xff] }
  0x5a   : > { %v816_v42 = vmul.f32 %v688_v32, %v173_v57  ;;  %v817_v43 = vmul.f32 %v689_v33, %v174_v55  ;;  %v818_v46 = vmul.f32 %v690_v34, %v175_v59  ;;  %v819_v47 = vmul.f32 %v691_v35, %v176_v56  ;;  %v184_v57 = vld [vmem:[%s1572_s30 + $0xf8] sm:$0xff] }
  0x5b   : > { %v941_v48 = vadd.f32 %v1592_v11, %v812_v36  ;;  %v942_v44 = vadd.f32 %v1592_v11, %v813_v37  ;;  %v943_v45 = vadd.f32 %v1592_v11, %v814_v38  ;;  %v944_v52 = vadd.f32 %v1592_v11, %v815_v39  ;;  %v185_v36 = vld [vmem:[%s1572_s30 + $0x100] sm:$0xff]  ;;  %v186_v37 = vld [vmem:[%s1572_s30 + $0x108] sm:$0xff] }
  0x5c   : > { %v945_v54 = vadd.f32 %v1592_v11, %v816_v42  ;;  %v946_v55 = vadd.f32 %v1592_v11, %v817_v43  ;;  %v947_v59 = vadd.f32 %v1592_v11, %v818_v46  ;;  %v948_v56 = vadd.f32 %v1592_v11, %v819_v47  ;;  %v187_v46 = vld [vmem:[%s1572_s30 + $0x110] sm:$0xff]  ;;  %v188_v47 = vld [vmem:[%s1572_s30 + $0x118] sm:$0xff] }
  0x5d   : > { %1069 = vst [vmem:[%s1636_s23 + $0x80] sm:$0xff] %v941_v48  ;;  %v306_v60 = vmul.f32 %v1586_v8, %v177_v40  ;;  %v307_v61 = vmul.f32 %v1586_v8, %v178_v41  ;;  %v308_v62 = vmul.f32 %v1586_v8, %v179_v50  ;;  %v309_v63 = vmul.f32 %v1586_v8, %v180_v51  ;;  %v189_v48 = vld [vmem:[%s1572_s30 + $0x120] sm:$0xff] }
  0x5e   : > { %1070 = vst [vmem:[%s1636_s23 + $0x88] sm:$0xff] %v942_v44  ;;  %v310_v0 = vmul.f32 %v1586_v8, %v181_v58  ;;  %v311_v1 = vmul.f32 %v1586_v8, %v182_v53  ;;  %v312_v2 = vmul.f32 %v1586_v8, %v183_v49  ;;  %v313_v3 = vmul.f32 %v1586_v8, %v184_v57 }
  0x5f   : > { %1071 = vst [vmem:[%s1636_s23 + $0x90] sm:$0xff] %v943_v45  ;;  %v435_v4 = vadd.f32 %v1588_v9, %v306_v60  ;;  %v436_v5 = vadd.f32 %v1588_v9, %v307_v61  ;;  %v437_v6 = vadd.f32 %v1588_v9, %v308_v62  ;;  %v438_v7 = vadd.f32 %v1588_v9, %v309_v63  ;;  %v191_v45 = vld [vmem:[%s1572_s30 + $0x130] sm:$0xff] }
  0x60   : > { %1072 = vst [vmem:[%s1636_s23 + $0x98] sm:$0xff] %v944_v52  ;;  %v439_v12 = vadd.f32 %v1588_v9, %v310_v0  ;;  %v440_v13 = vadd.f32 %v1588_v9, %v311_v1  ;;  %v441_v14 = vadd.f32 %v1588_v9, %v312_v2  ;;  %v442_v15 = vadd.f32 %v1588_v9, %v313_v3 }
  0x61   : > { %1073 = vst [vmem:[%s1636_s23 + $0xa0] sm:$0xff] %v945_v54  ;;  %v563_v16 = vmul.f32 %v435_v4, %v177_v40  ;;  %v564_v17 = vmul.f32 %v436_v5, %v178_v41  ;;  %v565_v18 = vmul.f32 %v437_v6, %v179_v50  ;;  %v566_v19 = vmul.f32 %v438_v7, %v180_v51 }
  0x62   : > { %1074 = vst [vmem:[%s1636_s23 + $0xa8] sm:$0xff] %v946_v55  ;;  %v567_v20 = vmul.f32 %v439_v12, %v181_v58  ;;  %v568_v21 = vmul.f32 %v440_v13, %v182_v53  ;;  %v569_v22 = vmul.f32 %v441_v14, %v183_v49  ;;  %v570_v23 = vmul.f32 %v442_v15, %v184_v57 }
  0x63   : > { %1075 = vst [vmem:[%s1636_s23 + $0xb0] sm:$0xff] %v947_v59  ;;  %v692_v24 = vadd.f32 %v1590_v10, %v563_v16  ;;  %v693_v25 = vadd.f32 %v1590_v10, %v564_v17  ;;  %v694_v26 = vadd.f32 %v1590_v10, %v565_v18  ;;  %v695_v27 = vadd.f32 %v1590_v10, %v566_v19 }
  0x64   : > { %1076 = vst [vmem:[%s1636_s23 + $0xb8] sm:$0xff] %v948_v56  ;;  %v696_v28 = vadd.f32 %v1590_v10, %v567_v20  ;;  %v697_v29 = vadd.f32 %v1590_v10, %v568_v21  ;;  %v698_v30 = vadd.f32 %v1590_v10, %v569_v22  ;;  %v699_v31 = vadd.f32 %v1590_v10, %v570_v23 }
  0x65   : > { %v820_v32 = vmul.f32 %v692_v24, %v177_v40  ;;  %v821_v33 = vmul.f32 %v693_v25, %v178_v41  ;;  %v822_v34 = vmul.f32 %v694_v26, %v179_v50  ;;  %v823_v35 = vmul.f32 %v695_v27, %v180_v51  ;;  %v190_v51 = vld [vmem:[%s1572_s30 + $0x128] sm:$0xff] }
  0x66   : > { %v824_v38 = vmul.f32 %v696_v28, %v181_v58  ;;  %v825_v39 = vmul.f32 %v697_v29, %v182_v53  ;;  %v826_v42 = vmul.f32 %v698_v30, %v183_v49  ;;  %v827_v43 = vmul.f32 %v699_v31, %v184_v57  ;;  %v192_v58 = vld [vmem:[%s1572_s30 + $0x138] sm:$0xff] }
  0x67   : > { %v949_v44 = vadd.f32 %v1592_v11, %v820_v32  ;;  %v950_v40 = vadd.f32 %v1592_v11, %v821_v33  ;;  %v951_v41 = vadd.f32 %v1592_v11, %v822_v34  ;;  %v952_v50 = vadd.f32 %v1592_v11, %v823_v35  ;;  %v193_v32 = vld [vmem:[%s1572_s30 + $0x140] sm:$0xff]  ;;  %v194_v33 = vld [vmem:[%s1572_s30 + $0x148] sm:$0xff] }
  0x68   : > { %v953_v52 = vadd.f32 %v1592_v11, %v824_v38  ;;  %v954_v53 = vadd.f32 %v1592_v11, %v825_v39  ;;  %v955_v49 = vadd.f32 %v1592_v11, %v826_v42  ;;  %v956_v57 = vadd.f32 %v1592_v11, %v827_v43  ;;  %v195_v42 = vld [vmem:[%s1572_s30 + $0x150] sm:$0xff]  ;;  %v196_v43 = vld [vmem:[%s1572_s30 + $0x158] sm:$0xff] }
  0x69   : > { %1077 = vst [vmem:[%s1636_s23 + $0xc0] sm:$0xff] %v949_v44  ;;  %v314_v54 = vmul.f32 %v1586_v8, %v185_v36  ;;  %v315_v55 = vmul.f32 %v1586_v8, %v186_v37  ;;  %v316_v59 = vmul.f32 %v1586_v8, %v187_v46  ;;  %v317_v56 = vmul.f32 %v1586_v8, %v188_v47  ;;  %v197_v44 = vld [vmem:[%s1572_s30 + $0x160] sm:$0xff] }
  0x6a   : > { %1078 = vst [vmem:[%s1636_s23 + $0xc8] sm:$0xff] %v950_v40  ;;  %v318_v60 = vmul.f32 %v1586_v8, %v189_v48  ;;  %v319_v61 = vmul.f32 %v1586_v8, %v190_v51  ;;  %v320_v62 = vmul.f32 %v1586_v8, %v191_v45  ;;  %v321_v63 = vmul.f32 %v1586_v8, %v192_v58 }
  0x6b   : > { %1079 = vst [vmem:[%s1636_s23 + $0xd0] sm:$0xff] %v951_v41  ;;  %v443_v0 = vadd.f32 %v1588_v9, %v314_v54  ;;  %v444_v1 = vadd.f32 %v1588_v9, %v315_v55  ;;  %v445_v2 = vadd.f32 %v1588_v9, %v316_v59  ;;  %v446_v3 = vadd.f32 %v1588_v9, %v317_v56  ;;  %v199_v41 = vld [vmem:[%s1572_s30 + $0x170] sm:$0xff] }
  0x6c   : > { %1080 = vst [vmem:[%s1636_s23 + $0xd8] sm:$0xff] %v952_v50  ;;  %v447_v4 = vadd.f32 %v1588_v9, %v318_v60  ;;  %v448_v5 = vadd.f32 %v1588_v9, %v319_v61  ;;  %v449_v6 = vadd.f32 %v1588_v9, %v320_v62  ;;  %v450_v7 = vadd.f32 %v1588_v9, %v321_v63 }
  0x6d   : > { %1081 = vst [vmem:[%s1636_s23 + $0xe0] sm:$0xff] %v953_v52  ;;  %v571_v12 = vmul.f32 %v443_v0, %v185_v36  ;;  %v572_v13 = vmul.f32 %v444_v1, %v186_v37  ;;  %v573_v14 = vmul.f32 %v445_v2, %v187_v46  ;;  %v574_v15 = vmul.f32 %v446_v3, %v188_v47 }
  0x6e   : > { %1082 = vst [vmem:[%s1636_s23 + $0xe8] sm:$0xff] %v954_v53  ;;  %v575_v16 = vmul.f32 %v447_v4, %v189_v48  ;;  %v576_v17 = vmul.f32 %v448_v5, %v190_v51  ;;  %v577_v18 = vmul.f32 %v449_v6, %v191_v45  ;;  %v578_v19 = vmul.f32 %v450_v7, %v192_v58 }
  0x6f   : > { %1083 = vst [vmem:[%s1636_s23 + $0xf0] sm:$0xff] %v955_v49  ;;  %v700_v20 = vadd.f32 %v1590_v10, %v571_v12  ;;  %v701_v21 = vadd.f32 %v1590_v10, %v572_v13  ;;  %v702_v22 = vadd.f32 %v1590_v10, %v573_v14  ;;  %v703_v23 = vadd.f32 %v1590_v10, %v574_v15 }
  0x70   : > { %1084 = vst [vmem:[%s1636_s23 + $0xf8] sm:$0xff] %v956_v57  ;;  %v704_v24 = vadd.f32 %v1590_v10, %v575_v16  ;;  %v705_v25 = vadd.f32 %v1590_v10, %v576_v17  ;;  %v706_v26 = vadd.f32 %v1590_v10, %v577_v18  ;;  %v707_v27 = vadd.f32 %v1590_v10, %v578_v19 }
  0x71   : > { %v828_v28 = vmul.f32 %v700_v20, %v185_v36  ;;  %v829_v29 = vmul.f32 %v701_v21, %v186_v37  ;;  %v830_v30 = vmul.f32 %v702_v22, %v187_v46  ;;  %v831_v31 = vmul.f32 %v703_v23, %v188_v47  ;;  %v198_v47 = vld [vmem:[%s1572_s30 + $0x168] sm:$0xff] }
  0x72   : > { %v832_v34 = vmul.f32 %v704_v24, %v189_v48  ;;  %v833_v35 = vmul.f32 %v705_v25, %v190_v51  ;;  %v834_v38 = vmul.f32 %v706_v26, %v191_v45  ;;  %v835_v39 = vmul.f32 %v707_v27, %v192_v58  ;;  %v200_v48 = vld [vmem:[%s1572_s30 + $0x178] sm:$0xff] }
  0x73   : > { %v957_v40 = vadd.f32 %v1592_v11, %v828_v28  ;;  %v958_v36 = vadd.f32 %v1592_v11, %v829_v29  ;;  %v959_v37 = vadd.f32 %v1592_v11, %v830_v30  ;;  %v960_v46 = vadd.f32 %v1592_v11, %v831_v31  ;;  %v201_v28 = vld [vmem:[%s1572_s30 + $0x180] sm:$0xff]  ;;  %v202_v29 = vld [vmem:[%s1572_s30 + $0x188] sm:$0xff] }
  0x74   : > { %v961_v50 = vadd.f32 %v1592_v11, %v832_v34  ;;  %v962_v51 = vadd.f32 %v1592_v11, %v833_v35  ;;  %v963_v45 = vadd.f32 %v1592_v11, %v834_v38  ;;  %v964_v58 = vadd.f32 %v1592_v11, %v835_v39  ;;  %v203_v38 = vld [vmem:[%s1572_s30 + $0x190] sm:$0xff]  ;;  %v204_v39 = vld [vmem:[%s1572_s30 + $0x198] sm:$0xff] }
  0x75   : > { %1085 = vst [vmem:[%s1636_s23 + $0x100] sm:$0xff] %v957_v40  ;;  %v322_v52 = vmul.f32 %v1586_v8, %v193_v32  ;;  %v323_v53 = vmul.f32 %v1586_v8, %v194_v33  ;;  %v324_v49 = vmul.f32 %v1586_v8, %v195_v42  ;;  %v325_v57 = vmul.f32 %v1586_v8, %v196_v43  ;;  %v205_v40 = vld [vmem:[%s1572_s30 + $0x1a0] sm:$0xff] }
  0x76   : > { %1086 = vst [vmem:[%s1636_s23 + $0x108] sm:$0xff] %v958_v36  ;;  %v326_v54 = vmul.f32 %v1586_v8, %v197_v44  ;;  %v327_v55 = vmul.f32 %v1586_v8, %v198_v47  ;;  %v328_v59 = vmul.f32 %v1586_v8, %v199_v41  ;;  %v329_v56 = vmul.f32 %v1586_v8, %v200_v48 }
  0x77   : > { %1087 = vst [vmem:[%s1636_s23 + $0x110] sm:$0xff] %v959_v37  ;;  %v451_v60 = vadd.f32 %v1588_v9, %v322_v52  ;;  %v452_v61 = vadd.f32 %v1588_v9, %v323_v53  ;;  %v453_v62 = vadd.f32 %v1588_v9, %v324_v49  ;;  %v454_v63 = vadd.f32 %v1588_v9, %v325_v57  ;;  %v207_v37 = vld [vmem:[%s1572_s30 + $0x1b0] sm:$0xff] }
  0x78   : > { %1088 = vst [vmem:[%s1636_s23 + $0x118] sm:$0xff] %v960_v46  ;;  %v455_v0 = vadd.f32 %v1588_v9, %v326_v54  ;;  %v456_v1 = vadd.f32 %v1588_v9, %v327_v55  ;;  %v457_v2 = vadd.f32 %v1588_v9, %v328_v59  ;;  %v458_v3 = vadd.f32 %v1588_v9, %v329_v56 }
  0x79   : > { %1089 = vst [vmem:[%s1636_s23 + $0x120] sm:$0xff] %v961_v50  ;;  %v579_v4 = vmul.f32 %v451_v60, %v193_v32  ;;  %v580_v5 = vmul.f32 %v452_v61, %v194_v33  ;;  %v581_v6 = vmul.f32 %v453_v62, %v195_v42  ;;  %v582_v7 = vmul.f32 %v454_v63, %v196_v43 }
  0x7a   : > { %1090 = vst [vmem:[%s1636_s23 + $0x128] sm:$0xff] %v962_v51  ;;  %v583_v12 = vmul.f32 %v455_v0, %v197_v44  ;;  %v584_v13 = vmul.f32 %v456_v1, %v198_v47  ;;  %v585_v14 = vmul.f32 %v457_v2, %v199_v41  ;;  %v586_v15 = vmul.f32 %v458_v3, %v200_v48 }
  0x7b   : > { %1091 = vst [vmem:[%s1636_s23 + $0x130] sm:$0xff] %v963_v45  ;;  %v708_v16 = vadd.f32 %v1590_v10, %v579_v4  ;;  %v709_v17 = vadd.f32 %v1590_v10, %v580_v5  ;;  %v710_v18 = vadd.f32 %v1590_v10, %v581_v6  ;;  %v711_v19 = vadd.f32 %v1590_v10, %v582_v7 }
  0x7c   : > { %1092 = vst [vmem:[%s1636_s23 + $0x138] sm:$0xff] %v964_v58  ;;  %v712_v20 = vadd.f32 %v1590_v10, %v583_v12  ;;  %v713_v21 = vadd.f32 %v1590_v10, %v584_v13  ;;  %v714_v22 = vadd.f32 %v1590_v10, %v585_v14  ;;  %v715_v23 = vadd.f32 %v1590_v10, %v586_v15 }
  0x7d   : > { %v836_v24 = vmul.f32 %v708_v16, %v193_v32  ;;  %v837_v25 = vmul.f32 %v709_v17, %v194_v33  ;;  %v838_v26 = vmul.f32 %v710_v18, %v195_v42  ;;  %v839_v27 = vmul.f32 %v711_v19, %v196_v43  ;;  %v206_v43 = vld [vmem:[%s1572_s30 + $0x1a8] sm:$0xff] }
  0x7e   : > { %v840_v30 = vmul.f32 %v712_v20, %v197_v44  ;;  %v841_v31 = vmul.f32 %v713_v21, %v198_v47  ;;  %v842_v34 = vmul.f32 %v714_v22, %v199_v41  ;;  %v843_v35 = vmul.f32 %v715_v23, %v200_v48  ;;  %v208_v44 = vld [vmem:[%s1572_s30 + $0x1b8] sm:$0xff] }
  0x7f   : > { %v965_v36 = vadd.f32 %v1592_v11, %v836_v24  ;;  %v966_v32 = vadd.f32 %v1592_v11, %v837_v25  ;;  %v967_v33 = vadd.f32 %v1592_v11, %v838_v26  ;;  %v968_v42 = vadd.f32 %v1592_v11, %v839_v27  ;;  %v209_v24 = vld [vmem:[%s1572_s30 + $0x1c0] sm:$0xff]  ;;  %v210_v25 = vld [vmem:[%s1572_s30 + $0x1c8] sm:$0xff] }
  0x80   : > { %v969_v46 = vadd.f32 %v1592_v11, %v840_v30  ;;  %v970_v47 = vadd.f32 %v1592_v11, %v841_v31  ;;  %v971_v41 = vadd.f32 %v1592_v11, %v842_v34  ;;  %v972_v48 = vadd.f32 %v1592_v11, %v843_v35  ;;  %v211_v34 = vld [vmem:[%s1572_s30 + $0x1d0] sm:$0xff]  ;;  %v212_v35 = vld [vmem:[%s1572_s30 + $0x1d8] sm:$0xff] }
  0x81   : > { %1093 = vst [vmem:[%s1636_s23 + $0x140] sm:$0xff] %v965_v36  ;;  %v330_v50 = vmul.f32 %v1586_v8, %v201_v28  ;;  %v331_v51 = vmul.f32 %v1586_v8, %v202_v29  ;;  %v332_v45 = vmul.f32 %v1586_v8, %v203_v38  ;;  %v333_v58 = vmul.f32 %v1586_v8, %v204_v39  ;;  %v213_v36 = vld [vmem:[%s1572_s30 + $0x1e0] sm:$0xff] }
  0x82   : > { %1094 = vst [vmem:[%s1636_s23 + $0x148] sm:$0xff] %v966_v32  ;;  %v334_v52 = vmul.f32 %v1586_v8, %v205_v40  ;;  %v335_v53 = vmul.f32 %v1586_v8, %v206_v43  ;;  %v336_v49 = vmul.f32 %v1586_v8, %v207_v37  ;;  %v337_v57 = vmul.f32 %v1586_v8, %v208_v44 }
  0x83   : > { %1095 = vst [vmem:[%s1636_s23 + $0x150] sm:$0xff] %v967_v33  ;;  %v459_v54 = vadd.f32 %v1588_v9, %v330_v50  ;;  %v460_v55 = vadd.f32 %v1588_v9, %v331_v51  ;;  %v461_v59 = vadd.f32 %v1588_v9, %v332_v45  ;;  %v462_v56 = vadd.f32 %v1588_v9, %v333_v58  ;;  %v215_v33 = vld [vmem:[%s1572_s30 + $0x1f0] sm:$0xff] }
  0x84   : > { %1096 = vst [vmem:[%s1636_s23 + $0x158] sm:$0xff] %v968_v42  ;;  %v463_v60 = vadd.f32 %v1588_v9, %v334_v52  ;;  %v464_v61 = vadd.f32 %v1588_v9, %v335_v53  ;;  %v465_v62 = vadd.f32 %v1588_v9, %v336_v49  ;;  %v466_v63 = vadd.f32 %v1588_v9, %v337_v57 }
  0x85   : > { %1097 = vst [vmem:[%s1636_s23 + $0x160] sm:$0xff] %v969_v46  ;;  %v587_v0 = vmul.f32 %v459_v54, %v201_v28  ;;  %v588_v1 = vmul.f32 %v460_v55, %v202_v29  ;;  %v589_v2 = vmul.f32 %v461_v59, %v203_v38  ;;  %v590_v3 = vmul.f32 %v462_v56, %v204_v39 }
  0x86   : > { %1098 = vst [vmem:[%s1636_s23 + $0x168] sm:$0xff] %v970_v47  ;;  %v591_v4 = vmul.f32 %v463_v60, %v205_v40  ;;  %v592_v5 = vmul.f32 %v464_v61, %v206_v43  ;;  %v593_v6 = vmul.f32 %v465_v62, %v207_v37  ;;  %v594_v7 = vmul.f32 %v466_v63, %v208_v44 }
  0x87   : > { %1099 = vst [vmem:[%s1636_s23 + $0x170] sm:$0xff] %v971_v41  ;;  %v716_v12 = vadd.f32 %v1590_v10, %v587_v0  ;;  %v717_v13 = vadd.f32 %v1590_v10, %v588_v1  ;;  %v718_v14 = vadd.f32 %v1590_v10, %v589_v2  ;;  %v719_v15 = vadd.f32 %v1590_v10, %v590_v3 }
  0x88   : > { %1100 = vst [vmem:[%s1636_s23 + $0x178] sm:$0xff] %v972_v48  ;;  %v720_v16 = vadd.f32 %v1590_v10, %v591_v4  ;;  %v721_v17 = vadd.f32 %v1590_v10, %v592_v5  ;;  %v722_v18 = vadd.f32 %v1590_v10, %v593_v6  ;;  %v723_v19 = vadd.f32 %v1590_v10, %v594_v7 }
  0x89   : > { %v844_v20 = vmul.f32 %v716_v12, %v201_v28  ;;  %v845_v21 = vmul.f32 %v717_v13, %v202_v29  ;;  %v846_v22 = vmul.f32 %v718_v14, %v203_v38  ;;  %v847_v23 = vmul.f32 %v719_v15, %v204_v39  ;;  %v214_v39 = vld [vmem:[%s1572_s30 + $0x1e8] sm:$0xff] }
  0x8a   : > { %v848_v26 = vmul.f32 %v720_v16, %v205_v40  ;;  %v849_v27 = vmul.f32 %v721_v17, %v206_v43  ;;  %v850_v30 = vmul.f32 %v722_v18, %v207_v37  ;;  %v851_v31 = vmul.f32 %v723_v19, %v208_v44  ;;  %v216_v40 = vld [vmem:[%s1572_s30 + $0x1f8] sm:$0xff] }
  0x8b   : > { %v973_v32 = vadd.f32 %v1592_v11, %v844_v20  ;;  %v974_v28 = vadd.f32 %v1592_v11, %v845_v21  ;;  %v975_v29 = vadd.f32 %v1592_v11, %v846_v22  ;;  %v976_v38 = vadd.f32 %v1592_v11, %v847_v23  ;;  %v217_v20 = vld [vmem:[%s1572_s30 + $0x200] sm:$0xff]  ;;  %v218_v21 = vld [vmem:[%s1572_s30 + $0x208] sm:$0xff] }
  0x8c   : > { %v977_v42 = vadd.f32 %v1592_v11, %v848_v26  ;;  %v978_v43 = vadd.f32 %v1592_v11, %v849_v27  ;;  %v979_v37 = vadd.f32 %v1592_v11, %v850_v30  ;;  %v980_v44 = vadd.f32 %v1592_v11, %v851_v31  ;;  %v219_v30 = vld [vmem:[%s1572_s30 + $0x210] sm:$0xff]  ;;  %v220_v31 = vld [vmem:[%s1572_s30 + $0x218] sm:$0xff] }
  0x8d   : > { %1101 = vst [vmem:[%s1636_s23 + $0x180] sm:$0xff] %v973_v32  ;;  %v338_v46 = vmul.f32 %v1586_v8, %v209_v24  ;;  %v339_v47 = vmul.f32 %v1586_v8, %v210_v25  ;;  %v340_v41 = vmul.f32 %v1586_v8, %v211_v34  ;;  %v341_v48 = vmul.f32 %v1586_v8, %v212_v35  ;;  %v221_v32 = vld [vmem:[%s1572_s30 + $0x220] sm:$0xff] }
  0x8e   : > { %1102 = vst [vmem:[%s1636_s23 + $0x188] sm:$0xff] %v974_v28  ;;  %v342_v50 = vmul.f32 %v1586_v8, %v213_v36  ;;  %v343_v51 = vmul.f32 %v1586_v8, %v214_v39  ;;  %v344_v45 = vmul.f32 %v1586_v8, %v215_v33  ;;  %v345_v58 = vmul.f32 %v1586_v8, %v216_v40 }
  0x8f   : > { %1103 = vst [vmem:[%s1636_s23 + $0x190] sm:$0xff] %v975_v29  ;;  %v467_v52 = vadd.f32 %v1588_v9, %v338_v46  ;;  %v468_v53 = vadd.f32 %v1588_v9, %v339_v47  ;;  %v469_v49 = vadd.f32 %v1588_v9, %v340_v41  ;;  %v470_v57 = vadd.f32 %v1588_v9, %v341_v48  ;;  %v223_v29 = vld [vmem:[%s1572_s30 + $0x230] sm:$0xff] }
  0x90   : > { %1104 = vst [vmem:[%s1636_s23 + $0x198] sm:$0xff] %v976_v38  ;;  %v471_v54 = vadd.f32 %v1588_v9, %v342_v50  ;;  %v472_v55 = vadd.f32 %v1588_v9, %v343_v51  ;;  %v473_v59 = vadd.f32 %v1588_v9, %v344_v45  ;;  %v474_v56 = vadd.f32 %v1588_v9, %v345_v58 }
  0x91   : > { %1105 = vst [vmem:[%s1636_s23 + $0x1a0] sm:$0xff] %v977_v42  ;;  %v595_v60 = vmul.f32 %v467_v52, %v209_v24  ;;  %v596_v61 = vmul.f32 %v468_v53, %v210_v25  ;;  %v597_v62 = vmul.f32 %v469_v49, %v211_v34  ;;  %v598_v63 = vmul.f32 %v470_v57, %v212_v35 }
  0x92   : > { %1106 = vst [vmem:[%s1636_s23 + $0x1a8] sm:$0xff] %v978_v43  ;;  %v599_v0 = vmul.f32 %v471_v54, %v213_v36  ;;  %v600_v1 = vmul.f32 %v472_v55, %v214_v39  ;;  %v601_v2 = vmul.f32 %v473_v59, %v215_v33  ;;  %v602_v3 = vmul.f32 %v474_v56, %v216_v40 }
  0x93   : > { %1107 = vst [vmem:[%s1636_s23 + $0x1b0] sm:$0xff] %v979_v37  ;;  %v724_v4 = vadd.f32 %v1590_v10, %v595_v60  ;;  %v725_v5 = vadd.f32 %v1590_v10, %v596_v61  ;;  %v726_v6 = vadd.f32 %v1590_v10, %v597_v62  ;;  %v727_v7 = vadd.f32 %v1590_v10, %v598_v63 }
  0x94   : > { %1108 = vst [vmem:[%s1636_s23 + $0x1b8] sm:$0xff] %v980_v44  ;;  %v728_v12 = vadd.f32 %v1590_v10, %v599_v0  ;;  %v729_v13 = vadd.f32 %v1590_v10, %v600_v1  ;;  %v730_v14 = vadd.f32 %v1590_v10, %v601_v2  ;;  %v731_v15 = vadd.f32 %v1590_v10, %v602_v3 }
  0x95   : > { %v852_v16 = vmul.f32 %v724_v4, %v209_v24  ;;  %v853_v17 = vmul.f32 %v725_v5, %v210_v25  ;;  %v854_v18 = vmul.f32 %v726_v6, %v211_v34  ;;  %v855_v19 = vmul.f32 %v727_v7, %v212_v35  ;;  %v222_v35 = vld [vmem:[%s1572_s30 + $0x228] sm:$0xff] }
  0x96   : > { %v856_v22 = vmul.f32 %v728_v12, %v213_v36  ;;  %v857_v23 = vmul.f32 %v729_v13, %v214_v39  ;;  %v858_v26 = vmul.f32 %v730_v14, %v215_v33  ;;  %v859_v27 = vmul.f32 %v731_v15, %v216_v40  ;;  %v224_v36 = vld [vmem:[%s1572_s30 + $0x238] sm:$0xff] }
  0x97   : > { %v981_v28 = vadd.f32 %v1592_v11, %v852_v16  ;;  %v982_v24 = vadd.f32 %v1592_v11, %v853_v17  ;;  %v983_v25 = vadd.f32 %v1592_v11, %v854_v18  ;;  %v984_v34 = vadd.f32 %v1592_v11, %v855_v19  ;;  %v225_v16 = vld [vmem:[%s1572_s30 + $0x240] sm:$0xff]  ;;  %v226_v17 = vld [vmem:[%s1572_s30 + $0x248] sm:$0xff] }
  0x98   : > { %v985_v38 = vadd.f32 %v1592_v11, %v856_v22  ;;  %v986_v39 = vadd.f32 %v1592_v11, %v857_v23  ;;  %v987_v33 = vadd.f32 %v1592_v11, %v858_v26  ;;  %v988_v40 = vadd.f32 %v1592_v11, %v859_v27  ;;  %v227_v26 = vld [vmem:[%s1572_s30 + $0x250] sm:$0xff]  ;;  %v228_v27 = vld [vmem:[%s1572_s30 + $0x258] sm:$0xff] }
  0x99   : > { %1109 = vst [vmem:[%s1636_s23 + $0x1c0] sm:$0xff] %v981_v28  ;;  %v346_v42 = vmul.f32 %v1586_v8, %v217_v20  ;;  %v347_v43 = vmul.f32 %v1586_v8, %v218_v21  ;;  %v348_v37 = vmul.f32 %v1586_v8, %v219_v30  ;;  %v349_v44 = vmul.f32 %v1586_v8, %v220_v31  ;;  %v229_v28 = vld [vmem:[%s1572_s30 + $0x260] sm:$0xff] }
  0x9a   : > { %1110 = vst [vmem:[%s1636_s23 + $0x1c8] sm:$0xff] %v982_v24  ;;  %v350_v46 = vmul.f32 %v1586_v8, %v221_v32  ;;  %v351_v47 = vmul.f32 %v1586_v8, %v222_v35  ;;  %v352_v41 = vmul.f32 %v1586_v8, %v223_v29  ;;  %v353_v48 = vmul.f32 %v1586_v8, %v224_v36 }
  0x9b   : > { %1111 = vst [vmem:[%s1636_s23 + $0x1d0] sm:$0xff] %v983_v25  ;;  %v475_v50 = vadd.f32 %v1588_v9, %v346_v42  ;;  %v476_v51 = vadd.f32 %v1588_v9, %v347_v43  ;;  %v477_v45 = vadd.f32 %v1588_v9, %v348_v37  ;;  %v478_v58 = vadd.f32 %v1588_v9, %v349_v44  ;;  %v231_v25 = vld [vmem:[%s1572_s30 + $0x270] sm:$0xff] }
  0x9c   : > { %1112 = vst [vmem:[%s1636_s23 + $0x1d8] sm:$0xff] %v984_v34  ;;  %v479_v52 = vadd.f32 %v1588_v9, %v350_v46  ;;  %v480_v53 = vadd.f32 %v1588_v9, %v351_v47  ;;  %v481_v49 = vadd.f32 %v1588_v9, %v352_v41  ;;  %v482_v57 = vadd.f32 %v1588_v9, %v353_v48 }
  0x9d   : > { %1113 = vst [vmem:[%s1636_s23 + $0x1e0] sm:$0xff] %v985_v38  ;;  %v603_v54 = vmul.f32 %v475_v50, %v217_v20  ;;  %v604_v55 = vmul.f32 %v476_v51, %v218_v21  ;;  %v605_v59 = vmul.f32 %v477_v45, %v219_v30  ;;  %v606_v56 = vmul.f32 %v478_v58, %v220_v31 }
  0x9e   : > { %1114 = vst [vmem:[%s1636_s23 + $0x1e8] sm:$0xff] %v986_v39  ;;  %v607_v60 = vmul.f32 %v479_v52, %v221_v32  ;;  %v608_v61 = vmul.f32 %v480_v53, %v222_v35  ;;  %v609_v62 = vmul.f32 %v481_v49, %v223_v29  ;;  %v610_v63 = vmul.f32 %v482_v57, %v224_v36 }
  0x9f   : > { %1115 = vst [vmem:[%s1636_s23 + $0x1f0] sm:$0xff] %v987_v33  ;;  %v732_v0 = vadd.f32 %v1590_v10, %v603_v54  ;;  %v733_v1 = vadd.f32 %v1590_v10, %v604_v55  ;;  %v734_v2 = vadd.f32 %v1590_v10, %v605_v59  ;;  %v735_v3 = vadd.f32 %v1590_v10, %v606_v56 }
  0xa0   : > { %1116 = vst [vmem:[%s1636_s23 + $0x1f8] sm:$0xff] %v988_v40  ;;  %v736_v4 = vadd.f32 %v1590_v10, %v607_v60  ;;  %v737_v5 = vadd.f32 %v1590_v10, %v608_v61  ;;  %v738_v6 = vadd.f32 %v1590_v10, %v609_v62  ;;  %v739_v7 = vadd.f32 %v1590_v10, %v610_v63 }
  0xa1   : > { %v860_v12 = vmul.f32 %v732_v0, %v217_v20  ;;  %v861_v13 = vmul.f32 %v733_v1, %v218_v21  ;;  %v862_v14 = vmul.f32 %v734_v2, %v219_v30  ;;  %v863_v15 = vmul.f32 %v735_v3, %v220_v31  ;;  %v230_v31 = vld [vmem:[%s1572_s30 + $0x268] sm:$0xff] }
  0xa2   : > { %v864_v18 = vmul.f32 %v736_v4, %v221_v32  ;;  %v865_v19 = vmul.f32 %v737_v5, %v222_v35  ;;  %v866_v22 = vmul.f32 %v738_v6, %v223_v29  ;;  %v867_v23 = vmul.f32 %v739_v7, %v224_v36  ;;  %v232_v32 = vld [vmem:[%s1572_s30 + $0x278] sm:$0xff] }
  0xa3   : > { %v989_v24 = vadd.f32 %v1592_v11, %v860_v12  ;;  %v990_v20 = vadd.f32 %v1592_v11, %v861_v13  ;;  %v991_v21 = vadd.f32 %v1592_v11, %v862_v14  ;;  %v992_v30 = vadd.f32 %v1592_v11, %v863_v15  ;;  %v233_v12 = vld [vmem:[%s1572_s30 + $0x280] sm:$0xff]  ;;  %v234_v13 = vld [vmem:[%s1572_s30 + $0x288] sm:$0xff] }
  0xa4   : > { %v993_v34 = vadd.f32 %v1592_v11, %v864_v18  ;;  %v994_v35 = vadd.f32 %v1592_v11, %v865_v19  ;;  %v995_v29 = vadd.f32 %v1592_v11, %v866_v22  ;;  %v996_v36 = vadd.f32 %v1592_v11, %v867_v23  ;;  %v235_v22 = vld [vmem:[%s1572_s30 + $0x290] sm:$0xff]  ;;  %v236_v23 = vld [vmem:[%s1572_s30 + $0x298] sm:$0xff] }
  0xa5   : > { %1117 = vst [vmem:[%s1636_s23 + $0x200] sm:$0xff] %v989_v24  ;;  %v354_v38 = vmul.f32 %v1586_v8, %v225_v16  ;;  %v355_v39 = vmul.f32 %v1586_v8, %v226_v17  ;;  %v356_v33 = vmul.f32 %v1586_v8, %v227_v26  ;;  %v357_v40 = vmul.f32 %v1586_v8, %v228_v27  ;;  %v237_v24 = vld [vmem:[%s1572_s30 + $0x2a0] sm:$0xff] }
  0xa6   : > { %1118 = vst [vmem:[%s1636_s23 + $0x208] sm:$0xff] %v990_v20  ;;  %v358_v42 = vmul.f32 %v1586_v8, %v229_v28  ;;  %v359_v43 = vmul.f32 %v1586_v8, %v230_v31  ;;  %v360_v37 = vmul.f32 %v1586_v8, %v231_v25  ;;  %v361_v44 = vmul.f32 %v1586_v8, %v232_v32 }
  0xa7   : > { %1119 = vst [vmem:[%s1636_s23 + $0x210] sm:$0xff] %v991_v21  ;;  %v483_v46 = vadd.f32 %v1588_v9, %v354_v38  ;;  %v484_v47 = vadd.f32 %v1588_v9, %v355_v39  ;;  %v485_v41 = vadd.f32 %v1588_v9, %v356_v33  ;;  %v486_v48 = vadd.f32 %v1588_v9, %v357_v40  ;;  %v239_v21 = vld [vmem:[%s1572_s30 + $0x2b0] sm:$0xff] }
  0xa8   : > { %1120 = vst [vmem:[%s1636_s23 + $0x218] sm:$0xff] %v992_v30  ;;  %v487_v50 = vadd.f32 %v1588_v9, %v358_v42  ;;  %v488_v51 = vadd.f32 %v1588_v9, %v359_v43  ;;  %v489_v45 = vadd.f32 %v1588_v9, %v360_v37  ;;  %v490_v58 = vadd.f32 %v1588_v9, %v361_v44 }
  0xa9   : > { %1121 = vst [vmem:[%s1636_s23 + $0x220] sm:$0xff] %v993_v34  ;;  %v611_v52 = vmul.f32 %v483_v46, %v225_v16  ;;  %v612_v53 = vmul.f32 %v484_v47, %v226_v17  ;;  %v613_v49 = vmul.f32 %v485_v41, %v227_v26  ;;  %v614_v57 = vmul.f32 %v486_v48, %v228_v27 }
  0xaa   : > { %1122 = vst [vmem:[%s1636_s23 + $0x228] sm:$0xff] %v994_v35  ;;  %v615_v54 = vmul.f32 %v487_v50, %v229_v28  ;;  %v616_v55 = vmul.f32 %v488_v51, %v230_v31  ;;  %v617_v59 = vmul.f32 %v489_v45, %v231_v25  ;;  %v618_v56 = vmul.f32 %v490_v58, %v232_v32 }
  0xab   : > { %1123 = vst [vmem:[%s1636_s23 + $0x230] sm:$0xff] %v995_v29  ;;  %v740_v60 = vadd.f32 %v1590_v10, %v611_v52  ;;  %v741_v61 = vadd.f32 %v1590_v10, %v612_v53  ;;  %v742_v62 = vadd.f32 %v1590_v10, %v613_v49  ;;  %v743_v63 = vadd.f32 %v1590_v10, %v614_v57 }
  0xac   : > { %1124 = vst [vmem:[%s1636_s23 + $0x238] sm:$0xff] %v996_v36  ;;  %v744_v0 = vadd.f32 %v1590_v10, %v615_v54  ;;  %v745_v1 = vadd.f32 %v1590_v10, %v616_v55  ;;  %v746_v2 = vadd.f32 %v1590_v10, %v617_v59  ;;  %v747_v3 = vadd.f32 %v1590_v10, %v618_v56 }
  0xad   : > { %v868_v4 = vmul.f32 %v740_v60, %v225_v16  ;;  %v869_v5 = vmul.f32 %v741_v61, %v226_v17  ;;  %v870_v6 = vmul.f32 %v742_v62, %v227_v26  ;;  %v871_v7 = vmul.f32 %v743_v63, %v228_v27  ;;  %v238_v27 = vld [vmem:[%s1572_s30 + $0x2a8] sm:$0xff] }
  0xae   : > { %v872_v14 = vmul.f32 %v744_v0, %v229_v28  ;;  %v873_v15 = vmul.f32 %v745_v1, %v230_v31  ;;  %v874_v18 = vmul.f32 %v746_v2, %v231_v25  ;;  %v875_v19 = vmul.f32 %v747_v3, %v232_v32  ;;  %v240_v28 = vld [vmem:[%s1572_s30 + $0x2b8] sm:$0xff] }
  0xaf   : > { %v997_v20 = vadd.f32 %v1592_v11, %v868_v4  ;;  %v998_v16 = vadd.f32 %v1592_v11, %v869_v5  ;;  %v999_v17 = vadd.f32 %v1592_v11, %v870_v6  ;;  %v1000_v26 = vadd.f32 %v1592_v11, %v871_v7  ;;  %v241_v4 = vld [vmem:[%s1572_s30 + $0x2c0] sm:$0xff]  ;;  %v242_v5 = vld [vmem:[%s1572_s30 + $0x2c8] sm:$0xff] }
  0xb0   : > { %v1001_v30 = vadd.f32 %v1592_v11, %v872_v14  ;;  %v1002_v31 = vadd.f32 %v1592_v11, %v873_v15  ;;  %v1003_v25 = vadd.f32 %v1592_v11, %v874_v18  ;;  %v1004_v32 = vadd.f32 %v1592_v11, %v875_v19  ;;  %v243_v18 = vld [vmem:[%s1572_s30 + $0x2d0] sm:$0xff]  ;;  %v244_v19 = vld [vmem:[%s1572_s30 + $0x2d8] sm:$0xff] }
  0xb1   : > { %1125 = vst [vmem:[%s1636_s23 + $0x240] sm:$0xff] %v997_v20  ;;  %v362_v34 = vmul.f32 %v1586_v8, %v233_v12  ;;  %v363_v35 = vmul.f32 %v1586_v8, %v234_v13  ;;  %v364_v29 = vmul.f32 %v1586_v8, %v235_v22  ;;  %v365_v36 = vmul.f32 %v1586_v8, %v236_v23  ;;  %v245_v20 = vld [vmem:[%s1572_s30 + $0x2e0] sm:$0xff] }
  0xb2   : > { %1126 = vst [vmem:[%s1636_s23 + $0x248] sm:$0xff] %v998_v16  ;;  %v366_v38 = vmul.f32 %v1586_v8, %v237_v24  ;;  %v367_v39 = vmul.f32 %v1586_v8, %v238_v27  ;;  %v368_v33 = vmul.f32 %v1586_v8, %v239_v21  ;;  %v369_v40 = vmul.f32 %v1586_v8, %v240_v28 }
  0xb3   : > { %1127 = vst [vmem:[%s1636_s23 + $0x250] sm:$0xff] %v999_v17  ;;  %v491_v42 = vadd.f32 %v1588_v9, %v362_v34  ;;  %v492_v43 = vadd.f32 %v1588_v9, %v363_v35  ;;  %v493_v37 = vadd.f32 %v1588_v9, %v364_v29  ;;  %v494_v44 = vadd.f32 %v1588_v9, %v365_v36  ;;  %v247_v17 = vld [vmem:[%s1572_s30 + $0x2f0] sm:$0xff] }
  0xb4   : > { %1128 = vst [vmem:[%s1636_s23 + $0x258] sm:$0xff] %v1000_v26  ;;  %v495_v46 = vadd.f32 %v1588_v9, %v366_v38  ;;  %v496_v47 = vadd.f32 %v1588_v9, %v367_v39  ;;  %v497_v41 = vadd.f32 %v1588_v9, %v368_v33  ;;  %v498_v48 = vadd.f32 %v1588_v9, %v369_v40 }
  0xb5   : > { %1129 = vst [vmem:[%s1636_s23 + $0x260] sm:$0xff] %v1001_v30  ;;  %v619_v50 = vmul.f32 %v491_v42, %v233_v12  ;;  %v620_v51 = vmul.f32 %v492_v43, %v234_v13  ;;  %v621_v45 = vmul.f32 %v493_v37, %v235_v22  ;;  %v622_v58 = vmul.f32 %v494_v44, %v236_v23 }
  0xb6   : > { %1130 = vst [vmem:[%s1636_s23 + $0x268] sm:$0xff] %v1002_v31  ;;  %v623_v52 = vmul.f32 %v495_v46, %v237_v24  ;;  %v624_v53 = vmul.f32 %v496_v47, %v238_v27  ;;  %v625_v49 = vmul.f32 %v497_v41, %v239_v21  ;;  %v626_v57 = vmul.f32 %v498_v48, %v240_v28 }
  0xb7   : > { %1131 = vst [vmem:[%s1636_s23 + $0x270] sm:$0xff] %v1003_v25  ;;  %v748_v54 = vadd.f32 %v1590_v10, %v619_v50  ;;  %v749_v55 = vadd.f32 %v1590_v10, %v620_v51  ;;  %v750_v59 = vadd.f32 %v1590_v10, %v621_v45  ;;  %v751_v56 = vadd.f32 %v1590_v10, %v622_v58 }
  0xb8   : > { %1132 = vst [vmem:[%s1636_s23 + $0x278] sm:$0xff] %v1004_v32  ;;  %v752_v60 = vadd.f32 %v1590_v10, %v623_v52  ;;  %v753_v61 = vadd.f32 %v1590_v10, %v624_v53  ;;  %v754_v62 = vadd.f32 %v1590_v10, %v625_v49  ;;  %v755_v63 = vadd.f32 %v1590_v10, %v626_v57 }
  0xb9   : > { %v876_v0 = vmul.f32 %v748_v54, %v233_v12  ;;  %v877_v1 = vmul.f32 %v749_v55, %v234_v13  ;;  %v878_v2 = vmul.f32 %v750_v59, %v235_v22  ;;  %v879_v3 = vmul.f32 %v751_v56, %v236_v23  ;;  %v246_v23 = vld [vmem:[%s1572_s30 + $0x2e8] sm:$0xff] }
  0xba   : > { %v880_v6 = vmul.f32 %v752_v60, %v237_v24  ;;  %v881_v7 = vmul.f32 %v753_v61, %v238_v27  ;;  %v882_v14 = vmul.f32 %v754_v62, %v239_v21  ;;  %v883_v15 = vmul.f32 %v755_v63, %v240_v28  ;;  %v248_v24 = vld [vmem:[%s1572_s30 + $0x2f8] sm:$0xff] }
  0xbb   : > { %v1005_v16 = vadd.f32 %v1592_v11, %v876_v0  ;;  %v1006_v12 = vadd.f32 %v1592_v11, %v877_v1  ;;  %v1007_v13 = vadd.f32 %v1592_v11, %v878_v2  ;;  %v1008_v22 = vadd.f32 %v1592_v11, %v879_v3  ;;  %v249_v0 = vld [vmem:[%s1572_s30 + $0x300] sm:$0xff]  ;;  %v250_v1 = vld [vmem:[%s1572_s30 + $0x308] sm:$0xff] }
  0xbc   : > { %v1009_v26 = vadd.f32 %v1592_v11, %v880_v6  ;;  %v1010_v27 = vadd.f32 %v1592_v11, %v881_v7  ;;  %v1011_v21 = vadd.f32 %v1592_v11, %v882_v14  ;;  %v1012_v28 = vadd.f32 %v1592_v11, %v883_v15  ;;  %v251_v14 = vld [vmem:[%s1572_s30 + $0x310] sm:$0xff]  ;;  %v252_v15 = vld [vmem:[%s1572_s30 + $0x318] sm:$0xff] }
  0xbd   : > { %1133 = vst [vmem:[%s1636_s23 + $0x280] sm:$0xff] %v1005_v16  ;;  %v370_v30 = vmul.f32 %v1586_v8, %v241_v4  ;;  %v371_v31 = vmul.f32 %v1586_v8, %v242_v5  ;;  %v372_v25 = vmul.f32 %v1586_v8, %v243_v18  ;;  %v373_v32 = vmul.f32 %v1586_v8, %v244_v19  ;;  %v253_v16 = vld [vmem:[%s1572_s30 + $0x320] sm:$0xff] }
  0xbe   : > { %1134 = vst [vmem:[%s1636_s23 + $0x288] sm:$0xff] %v1006_v12  ;;  %v374_v34 = vmul.f32 %v1586_v8, %v245_v20  ;;  %v375_v35 = vmul.f32 %v1586_v8, %v246_v23  ;;  %v376_v29 = vmul.f32 %v1586_v8, %v247_v17  ;;  %v377_v36 = vmul.f32 %v1586_v8, %v248_v24 }
  0xbf   : > { %1135 = vst [vmem:[%s1636_s23 + $0x290] sm:$0xff] %v1007_v13  ;;  %v499_v38 = vadd.f32 %v1588_v9, %v370_v30  ;;  %v500_v39 = vadd.f32 %v1588_v9, %v371_v31  ;;  %v501_v33 = vadd.f32 %v1588_v9, %v372_v25  ;;  %v502_v40 = vadd.f32 %v1588_v9, %v373_v32  ;;  %v255_v13 = vld [vmem:[%s1572_s30 + $0x330] sm:$0xff] }
  0xc0   : > { %1136 = vst [vmem:[%s1636_s23 + $0x298] sm:$0xff] %v1008_v22  ;;  %v503_v42 = vadd.f32 %v1588_v9, %v374_v34  ;;  %v504_v43 = vadd.f32 %v1588_v9, %v375_v35  ;;  %v505_v37 = vadd.f32 %v1588_v9, %v376_v29  ;;  %v506_v44 = vadd.f32 %v1588_v9, %v377_v36 }
  0xc1   : > { %1137 = vst [vmem:[%s1636_s23 + $0x2a0] sm:$0xff] %v1009_v26  ;;  %v627_v46 = vmul.f32 %v499_v38, %v241_v4  ;;  %v628_v47 = vmul.f32 %v500_v39, %v242_v5  ;;  %v629_v41 = vmul.f32 %v501_v33, %v243_v18  ;;  %v630_v48 = vmul.f32 %v502_v40, %v244_v19 }
  0xc2   : > { %1138 = vst [vmem:[%s1636_s23 + $0x2a8] sm:$0xff] %v1010_v27  ;;  %v631_v50 = vmul.f32 %v503_v42, %v245_v20  ;;  %v632_v51 = vmul.f32 %v504_v43, %v246_v23  ;;  %v633_v45 = vmul.f32 %v505_v37, %v247_v17  ;;  %v634_v58 = vmul.f32 %v506_v44, %v248_v24 }
  0xc3   : > { %1139 = vst [vmem:[%s1636_s23 + $0x2b0] sm:$0xff] %v1011_v21  ;;  %v756_v52 = vadd.f32 %v1590_v10, %v627_v46  ;;  %v757_v53 = vadd.f32 %v1590_v10, %v628_v47  ;;  %v758_v49 = vadd.f32 %v1590_v10, %v629_v41  ;;  %v759_v57 = vadd.f32 %v1590_v10, %v630_v48 }
  0xc4   : > { %1140 = vst [vmem:[%s1636_s23 + $0x2b8] sm:$0xff] %v1012_v28  ;;  %v760_v54 = vadd.f32 %v1590_v10, %v631_v50  ;;  %v761_v55 = vadd.f32 %v1590_v10, %v632_v51  ;;  %v762_v59 = vadd.f32 %v1590_v10, %v633_v45  ;;  %v763_v56 = vadd.f32 %v1590_v10, %v634_v58 }
  0xc5   : > { %v884_v60 = vmul.f32 %v756_v52, %v241_v4  ;;  %v885_v61 = vmul.f32 %v757_v53, %v242_v5  ;;  %v886_v62 = vmul.f32 %v758_v49, %v243_v18  ;;  %v887_v63 = vmul.f32 %v759_v57, %v244_v19  ;;  %v254_v19 = vld [vmem:[%s1572_s30 + $0x328] sm:$0xff] }
  0xc6   : > { %v888_v2 = vmul.f32 %v760_v54, %v245_v20  ;;  %v889_v3 = vmul.f32 %v761_v55, %v246_v23  ;;  %v890_v6 = vmul.f32 %v762_v59, %v247_v17  ;;  %v891_v7 = vmul.f32 %v763_v56, %v248_v24  ;;  %v256_v20 = vld [vmem:[%s1572_s30 + $0x338] sm:$0xff] }
  0xc7   : > { %v1013_v12 = vadd.f32 %v1592_v11, %v884_v60  ;;  %v1014_v4 = vadd.f32 %v1592_v11, %v885_v61  ;;  %v1015_v5 = vadd.f32 %v1592_v11, %v886_v62  ;;  %v1016_v18 = vadd.f32 %v1592_v11, %v887_v63  ;;  %v257_v60 = vld [vmem:[%s1572_s30 + $0x340] sm:$0xff]  ;;  %v258_v61 = vld [vmem:[%s1572_s30 + $0x348] sm:$0xff] }
  0xc8   : > { %v1017_v22 = vadd.f32 %v1592_v11, %v888_v2  ;;  %v1018_v23 = vadd.f32 %v1592_v11, %v889_v3  ;;  %v1019_v17 = vadd.f32 %v1592_v11, %v890_v6  ;;  %v1020_v24 = vadd.f32 %v1592_v11, %v891_v7  ;;  %v259_v6 = vld [vmem:[%s1572_s30 + $0x350] sm:$0xff]  ;;  %v260_v7 = vld [vmem:[%s1572_s30 + $0x358] sm:$0xff] }
  0xc9   : > { %1141 = vst [vmem:[%s1636_s23 + $0x2c0] sm:$0xff] %v1013_v12  ;;  %v378_v26 = vmul.f32 %v1586_v8, %v249_v0  ;;  %v379_v27 = vmul.f32 %v1586_v8, %v250_v1  ;;  %v380_v21 = vmul.f32 %v1586_v8, %v251_v14  ;;  %v381_v28 = vmul.f32 %v1586_v8, %v252_v15  ;;  %v261_v12 = vld [vmem:[%s1572_s30 + $0x360] sm:$0xff] }
  0xca   : > { %1142 = vst [vmem:[%s1636_s23 + $0x2c8] sm:$0xff] %v1014_v4  ;;  %v382_v30 = vmul.f32 %v1586_v8, %v253_v16  ;;  %v383_v31 = vmul.f32 %v1586_v8, %v254_v19  ;;  %v384_v25 = vmul.f32 %v1586_v8, %v255_v13  ;;  %v385_v32 = vmul.f32 %v1586_v8, %v256_v20 }
  0xcb   : > { %1143 = vst [vmem:[%s1636_s23 + $0x2d0] sm:$0xff] %v1015_v5  ;;  %v507_v34 = vadd.f32 %v1588_v9, %v378_v26  ;;  %v508_v35 = vadd.f32 %v1588_v9, %v379_v27  ;;  %v509_v29 = vadd.f32 %v1588_v9, %v380_v21  ;;  %v510_v36 = vadd.f32 %v1588_v9, %v381_v28  ;;  %v263_v5 = vld [vmem:[%s1572_s30 + $0x370] sm:$0xff] }
  0xcc   : > { %1144 = vst [vmem:[%s1636_s23 + $0x2d8] sm:$0xff] %v1016_v18  ;;  %v511_v38 = vadd.f32 %v1588_v9, %v382_v30  ;;  %v512_v39 = vadd.f32 %v1588_v9, %v383_v31  ;;  %v513_v33 = vadd.f32 %v1588_v9, %v384_v25  ;;  %v514_v40 = vadd.f32 %v1588_v9, %v385_v32 }
  0xcd   : > { %1145 = vst [vmem:[%s1636_s23 + $0x2e0] sm:$0xff] %v1017_v22  ;;  %v635_v42 = vmul.f32 %v507_v34, %v249_v0  ;;  %v636_v43 = vmul.f32 %v508_v35, %v250_v1  ;;  %v637_v37 = vmul.f32 %v509_v29, %v251_v14  ;;  %v638_v44 = vmul.f32 %v510_v36, %v252_v15 }
  0xce   : > { %1146 = vst [vmem:[%s1636_s23 + $0x2e8] sm:$0xff] %v1018_v23  ;;  %v639_v46 = vmul.f32 %v511_v38, %v253_v16  ;;  %v640_v47 = vmul.f32 %v512_v39, %v254_v19  ;;  %v641_v41 = vmul.f32 %v513_v33, %v255_v13  ;;  %v642_v48 = vmul.f32 %v514_v40, %v256_v20 }
  0xcf   : > { %1147 = vst [vmem:[%s1636_s23 + $0x2f0] sm:$0xff] %v1019_v17  ;;  %v764_v50 = vadd.f32 %v1590_v10, %v635_v42  ;;  %v765_v51 = vadd.f32 %v1590_v10, %v636_v43  ;;  %v766_v45 = vadd.f32 %v1590_v10, %v637_v37  ;;  %v767_v58 = vadd.f32 %v1590_v10, %v638_v44 }
  0xd0   : > { %1148 = vst [vmem:[%s1636_s23 + $0x2f8] sm:$0xff] %v1020_v24  ;;  %v768_v52 = vadd.f32 %v1590_v10, %v639_v46  ;;  %v769_v53 = vadd.f32 %v1590_v10, %v640_v47  ;;  %v770_v49 = vadd.f32 %v1590_v10, %v641_v41  ;;  %v771_v57 = vadd.f32 %v1590_v10, %v642_v48 }
  0xd1   : > { %v892_v54 = vmul.f32 %v764_v50, %v249_v0  ;;  %v893_v55 = vmul.f32 %v765_v51, %v250_v1  ;;  %v894_v59 = vmul.f32 %v766_v45, %v251_v14  ;;  %v895_v56 = vmul.f32 %v767_v58, %v252_v15  ;;  %v262_v15 = vld [vmem:[%s1572_s30 + $0x368] sm:$0xff] }
  0xd2   : > { %v896_v62 = vmul.f32 %v768_v52, %v253_v16  ;;  %v897_v63 = vmul.f32 %v769_v53, %v254_v19  ;;  %v898_v2 = vmul.f32 %v770_v49, %v255_v13  ;;  %v899_v3 = vmul.f32 %v771_v57, %v256_v20  ;;  %v264_v16 = vld [vmem:[%s1572_s30 + $0x378] sm:$0xff] }
  0xd3   : > { %v1021_v4 = vadd.f32 %v1592_v11, %v892_v54  ;;  %v1022_v0 = vadd.f32 %v1592_v11, %v893_v55  ;;  %v1023_v1 = vadd.f32 %v1592_v11, %v894_v59  ;;  %v1024_v14 = vadd.f32 %v1592_v11, %v895_v56  ;;  %v265_v54 = vld [vmem:[%s1572_s30 + $0x380] sm:$0xff]  ;;  %v266_v55 = vld [vmem:[%s1572_s30 + $0x388] sm:$0xff] }
  0xd4   : > { %v1025_v18 = vadd.f32 %v1592_v11, %v896_v62  ;;  %v1026_v19 = vadd.f32 %v1592_v11, %v897_v63  ;;  %v1027_v13 = vadd.f32 %v1592_v11, %v898_v2  ;;  %v1028_v20 = vadd.f32 %v1592_v11, %v899_v3  ;;  %v267_v2 = vld [vmem:[%s1572_s30 + $0x390] sm:$0xff]  ;;  %v268_v3 = vld [vmem:[%s1572_s30 + $0x398] sm:$0xff] }
  0xd5   : > { %1149 = vst [vmem:[%s1636_s23 + $0x300] sm:$0xff] %v1021_v4  ;;  %v386_v22 = vmul.f32 %v1586_v8, %v257_v60  ;;  %v387_v23 = vmul.f32 %v1586_v8, %v258_v61  ;;  %v388_v17 = vmul.f32 %v1586_v8, %v259_v6  ;;  %v389_v24 = vmul.f32 %v1586_v8, %v260_v7  ;;  %v269_v4 = vld [vmem:[%s1572_s30 + $0x3a0] sm:$0xff] }
  0xd6   : > { %1150 = vst [vmem:[%s1636_s23 + $0x308] sm:$0xff] %v1022_v0  ;;  %v390_v26 = vmul.f32 %v1586_v8, %v261_v12  ;;  %v391_v27 = vmul.f32 %v1586_v8, %v262_v15  ;;  %v392_v21 = vmul.f32 %v1586_v8, %v263_v5  ;;  %v393_v28 = vmul.f32 %v1586_v8, %v264_v16 }
  0xd7   : > { %1151 = vst [vmem:[%s1636_s23 + $0x310] sm:$0xff] %v1023_v1  ;;  %v515_v30 = vadd.f32 %v1588_v9, %v386_v22  ;;  %v516_v31 = vadd.f32 %v1588_v9, %v387_v23  ;;  %v517_v25 = vadd.f32 %v1588_v9, %v388_v17  ;;  %v518_v32 = vadd.f32 %v1588_v9, %v389_v24  ;;  %v271_v1 = vld [vmem:[%s1572_s30 + $0x3b0] sm:$0xff] }
  0xd8   : > { %1152 = vst [vmem:[%s1636_s23 + $0x318] sm:$0xff] %v1024_v14  ;;  %v519_v34 = vadd.f32 %v1588_v9, %v390_v26  ;;  %v520_v35 = vadd.f32 %v1588_v9, %v391_v27  ;;  %v521_v29 = vadd.f32 %v1588_v9, %v392_v21  ;;  %v522_v36 = vadd.f32 %v1588_v9, %v393_v28 }
  0xd9   : > { %1153 = vst [vmem:[%s1636_s23 + $0x320] sm:$0xff] %v1025_v18  ;;  %v643_v38 = vmul.f32 %v515_v30, %v257_v60  ;;  %v644_v39 = vmul.f32 %v516_v31, %v258_v61  ;;  %v645_v33 = vmul.f32 %v517_v25, %v259_v6  ;;  %v646_v40 = vmul.f32 %v518_v32, %v260_v7 }
  0xda   : > { %1154 = vst [vmem:[%s1636_s23 + $0x328] sm:$0xff] %v1026_v19  ;;  %v647_v42 = vmul.f32 %v519_v34, %v261_v12  ;;  %v648_v43 = vmul.f32 %v520_v35, %v262_v15  ;;  %v649_v37 = vmul.f32 %v521_v29, %v263_v5  ;;  %v650_v44 = vmul.f32 %v522_v36, %v264_v16 }
  0xdb   : > { %1155 = vst [vmem:[%s1636_s23 + $0x330] sm:$0xff] %v1027_v13  ;;  %v772_v46 = vadd.f32 %v1590_v10, %v643_v38  ;;  %v773_v47 = vadd.f32 %v1590_v10, %v644_v39  ;;  %v774_v41 = vadd.f32 %v1590_v10, %v645_v33  ;;  %v775_v48 = vadd.f32 %v1590_v10, %v646_v40 }
  0xdc   : > { %1156 = vst [vmem:[%s1636_s23 + $0x338] sm:$0xff] %v1028_v20  ;;  %v776_v50 = vadd.f32 %v1590_v10, %v647_v42  ;;  %v777_v51 = vadd.f32 %v1590_v10, %v648_v43  ;;  %v778_v45 = vadd.f32 %v1590_v10, %v649_v37  ;;  %v779_v58 = vadd.f32 %v1590_v10, %v650_v44 }
  0xdd   : > { %v900_v52 = vmul.f32 %v772_v46, %v257_v60  ;;  %v901_v53 = vmul.f32 %v773_v47, %v258_v61  ;;  %v902_v49 = vmul.f32 %v774_v41, %v259_v6  ;;  %v903_v57 = vmul.f32 %v775_v48, %v260_v7  ;;  %v270_v7 = vld [vmem:[%s1572_s30 + $0x3a8] sm:$0xff] }
  0xde   : > { %v904_v59 = vmul.f32 %v776_v50, %v261_v12  ;;  %v905_v56 = vmul.f32 %v777_v51, %v262_v15  ;;  %v906_v62 = vmul.f32 %v778_v45, %v263_v5  ;;  %v907_v63 = vmul.f32 %v779_v58, %v264_v16  ;;  %v272_v12 = vld [vmem:[%s1572_s30 + $0x3b8] sm:$0xff] }
  0xdf   : > { %v1029_v0 = vadd.f32 %v1592_v11, %v900_v52  ;;  %v1030_v60 = vadd.f32 %v1592_v11, %v901_v53  ;;  %v1031_v61 = vadd.f32 %v1592_v11, %v902_v49  ;;  %v1032_v6 = vadd.f32 %v1592_v11, %v903_v57  ;;  %v273_v52 = vld [vmem:[%s1572_s30 + $0x3c0] sm:$0xff]  ;;  %v274_v53 = vld [vmem:[%s1572_s30 + $0x3c8] sm:$0xff] }
  0xe0   : > { %v1033_v14 = vadd.f32 %v1592_v11, %v904_v59  ;;  %v1034_v15 = vadd.f32 %v1592_v11, %v905_v56  ;;  %v1035_v5 = vadd.f32 %v1592_v11, %v906_v62  ;;  %v1036_v16 = vadd.f32 %v1592_v11, %v907_v63  ;;  %v275_v62 = vld [vmem:[%s1572_s30 + $0x3d0] sm:$0xff]  ;;  %v276_v63 = vld [vmem:[%s1572_s30 + $0x3d8] sm:$0xff] }
  0xe1   : > { %1157 = vst [vmem:[%s1636_s23 + $0x340] sm:$0xff] %v1029_v0  ;;  %v394_v18 = vmul.f32 %v1586_v8, %v265_v54  ;;  %v395_v19 = vmul.f32 %v1586_v8, %v266_v55  ;;  %v396_v13 = vmul.f32 %v1586_v8, %v267_v2  ;;  %v397_v20 = vmul.f32 %v1586_v8, %v268_v3  ;;  %v277_v0 = vld [vmem:[%s1572_s30 + $0x3e0] sm:$0xff] }
  0xe2   : > { %1158 = vst [vmem:[%s1636_s23 + $0x348] sm:$0xff] %v1030_v60  ;;  %v398_v22 = vmul.f32 %v1586_v8, %v269_v4  ;;  %v399_v23 = vmul.f32 %v1586_v8, %v270_v7  ;;  %v400_v17 = vmul.f32 %v1586_v8, %v271_v1  ;;  %v401_v24 = vmul.f32 %v1586_v8, %v272_v12 }
  0xe3   : > { %1159 = vst [vmem:[%s1636_s23 + $0x350] sm:$0xff] %v1031_v61  ;;  %v523_v26 = vadd.f32 %v1588_v9, %v394_v18  ;;  %v524_v27 = vadd.f32 %v1588_v9, %v395_v19  ;;  %v525_v21 = vadd.f32 %v1588_v9, %v396_v13  ;;  %v526_v28 = vadd.f32 %v1588_v9, %v397_v20  ;;  %v279_v61 = vld [vmem:[%s1572_s30 + $0x3f0] sm:$0xff] }
  0xe4   : > { %1160 = vst [vmem:[%s1636_s23 + $0x358] sm:$0xff] %v1032_v6  ;;  %v527_v30 = vadd.f32 %v1588_v9, %v398_v22  ;;  %v528_v31 = vadd.f32 %v1588_v9, %v399_v23  ;;  %v529_v25 = vadd.f32 %v1588_v9, %v400_v17  ;;  %v530_v32 = vadd.f32 %v1588_v9, %v401_v24 }
  0xe5   : > { %1161 = vst [vmem:[%s1636_s23 + $0x360] sm:$0xff] %v1033_v14  ;;  %v651_v34 = vmul.f32 %v523_v26, %v265_v54  ;;  %v652_v35 = vmul.f32 %v524_v27, %v266_v55  ;;  %v653_v29 = vmul.f32 %v525_v21, %v267_v2  ;;  %v654_v36 = vmul.f32 %v526_v28, %v268_v3 }
  0xe6   : > { %1162 = vst [vmem:[%s1636_s23 + $0x368] sm:$0xff] %v1034_v15  ;;  %v655_v38 = vmul.f32 %v527_v30, %v269_v4  ;;  %v656_v39 = vmul.f32 %v528_v31, %v270_v7  ;;  %v657_v33 = vmul.f32 %v529_v25, %v271_v1  ;;  %v658_v40 = vmul.f32 %v530_v32, %v272_v12 }
  0xe7   : > { %1163 = vst [vmem:[%s1636_s23 + $0x370] sm:$0xff] %v1035_v5  ;;  %v780_v42 = vadd.f32 %v1590_v10, %v651_v34  ;;  %v781_v43 = vadd.f32 %v1590_v10, %v652_v35  ;;  %v782_v37 = vadd.f32 %v1590_v10, %v653_v29  ;;  %v783_v44 = vadd.f32 %v1590_v10, %v654_v36 }
  0xe8   : > { %1164 = vst [vmem:[%s1636_s23 + $0x378] sm:$0xff] %v1036_v16  ;;  %v784_v46 = vadd.f32 %v1590_v10, %v655_v38  ;;  %v785_v47 = vadd.f32 %v1590_v10, %v656_v39  ;;  %v786_v41 = vadd.f32 %v1590_v10, %v657_v33  ;;  %v787_v48 = vadd.f32 %v1590_v10, %v658_v40 }
  0xe9   : > { %v908_v50 = vmul.f32 %v780_v42, %v265_v54  ;;  %v909_v51 = vmul.f32 %v781_v43, %v266_v55  ;;  %v910_v45 = vmul.f32 %v782_v37, %v267_v2  ;;  %v911_v58 = vmul.f32 %v783_v44, %v268_v3  ;;  %v278_v3 = vld [vmem:[%s1572_s30 + $0x3e8] sm:$0xff] }
  0xea   : > { %v912_v49 = vmul.f32 %v784_v46, %v269_v4  ;;  %v913_v57 = vmul.f32 %v785_v47, %v270_v7  ;;  %v914_v59 = vmul.f32 %v786_v41, %v271_v1  ;;  %v915_v56 = vmul.f32 %v787_v48, %v272_v12  ;;  %v280_v4 = vld [vmem:[%s1572_s30 + $0x3f8] sm:$0xff] }
  0xeb   : > { %v1037_v60 = vadd.f32 %v1592_v11, %v908_v50  ;;  %v1038_v54 = vadd.f32 %v1592_v11, %v909_v51  ;;  %v1039_v55 = vadd.f32 %v1592_v11, %v910_v45  ;;  %v1040_v2 = vadd.f32 %v1592_v11, %v911_v58 }
  0xec   : > { %v1041_v6 = vadd.f32 %v1592_v11, %v912_v49  ;;  %v1042_v7 = vadd.f32 %v1592_v11, %v913_v57  ;;  %v1043_v1 = vadd.f32 %v1592_v11, %v914_v59  ;;  %v1044_v12 = vadd.f32 %v1592_v11, %v915_v56 }
  0xed   : > { %1165 = vst [vmem:[%s1636_s23 + $0x380] sm:$0xff] %v1037_v60  ;;  %v402_v14 = vmul.f32 %v1586_v8, %v273_v52  ;;  %v403_v15 = vmul.f32 %v1586_v8, %v274_v53  ;;  %v404_v5 = vmul.f32 %v1586_v8, %v275_v62  ;;  %v405_v16 = vmul.f32 %v1586_v8, %v276_v63 }
  0xee   : > { %1166 = vst [vmem:[%s1636_s23 + $0x388] sm:$0xff] %v1038_v54  ;;  %v406_v18 = vmul.f32 %v1586_v8, %v277_v0  ;;  %v407_v19 = vmul.f32 %v1586_v8, %v278_v3  ;;  %v408_v13 = vmul.f32 %v1586_v8, %v279_v61  ;;  %v409_v20 = vmul.f32 %v1586_v8, %v280_v4 }
  0xef   : > { %1167 = vst [vmem:[%s1636_s23 + $0x390] sm:$0xff] %v1039_v55  ;;  %v531_v22 = vadd.f32 %v1588_v9, %v402_v14  ;;  %v532_v23 = vadd.f32 %v1588_v9, %v403_v15  ;;  %v533_v17 = vadd.f32 %v1588_v9, %v404_v5  ;;  %v534_v24 = vadd.f32 %v1588_v9, %v405_v16 }
  0xf0   : > { %1168 = vst [vmem:[%s1636_s23 + $0x398] sm:$0xff] %v1040_v2  ;;  %v535_v26 = vadd.f32 %v1588_v9, %v406_v18  ;;  %v536_v27 = vadd.f32 %v1588_v9, %v407_v19  ;;  %v537_v21 = vadd.f32 %v1588_v9, %v408_v13  ;;  %v538_v8 = vadd.f32 %v1588_v9, %v409_v20 }
  0xf1   : > { %1169 = vst [vmem:[%s1636_s23 + $0x3a0] sm:$0xff] %v1041_v6  ;;  %v659_v28 = vmul.f32 %v531_v22, %v273_v52  ;;  %v660_v30 = vmul.f32 %v532_v23, %v274_v53  ;;  %v661_v31 = vmul.f32 %v533_v17, %v275_v62  ;;  %v662_v25 = vmul.f32 %v534_v24, %v276_v63 }
  0xf2   : > { %1170 = vst [vmem:[%s1636_s23 + $0x3a8] sm:$0xff] %v1042_v7  ;;  %v663_v32 = vmul.f32 %v535_v26, %v277_v0  ;;  %v664_v34 = vmul.f32 %v536_v27, %v278_v3  ;;  %v665_v35 = vmul.f32 %v537_v21, %v279_v61  ;;  %v666_v29 = vmul.f32 %v538_v8, %v280_v4 }
  0xf3   : > { %1171 = vst [vmem:[%s1636_s23 + $0x3b0] sm:$0xff] %v1043_v1  ;;  %v788_v36 = vadd.f32 %v1590_v10, %v659_v28  ;;  %v789_v38 = vadd.f32 %v1590_v10, %v660_v30  ;;  %v790_v39 = vadd.f32 %v1590_v10, %v661_v31  ;;  %v791_v9 = vadd.f32 %v1590_v10, %v662_v25 }
  0xf4   : > { %1172 = vst [vmem:[%s1636_s23 + $0x3b8] sm:$0xff] %v1044_v12  ;;  %v792_v33 = vadd.f32 %v1590_v10, %v663_v32  ;;  %v793_v40 = vadd.f32 %v1590_v10, %v664_v34  ;;  %v794_v42 = vadd.f32 %v1590_v10, %v665_v35  ;;  %v795_v43 = vadd.f32 %v1590_v10, %v666_v29 }
  0xf5   : > { %v916_v37 = vmul.f32 %v788_v36, %v273_v52  ;;  %v917_v44 = vmul.f32 %v789_v38, %v274_v53  ;;  %v918_v46 = vmul.f32 %v790_v39, %v275_v62  ;;  %v919_v47 = vmul.f32 %v791_v9, %v276_v63 }
  0xf6   : > { %v920_v41 = vmul.f32 %v792_v33, %v277_v0  ;;  %v921_v48 = vmul.f32 %v793_v40, %v278_v3  ;;  %v922_v58 = vmul.f32 %v794_v42, %v279_v61  ;;  %v923_v52 = vmul.f32 %v795_v43, %v280_v4 }
  0xf7   : > { %v1045_v50 = vadd.f32 %v1592_v11, %v916_v37  ;;  %v1046_v51 = vadd.f32 %v1592_v11, %v917_v44  ;;  %v1047_v45 = vadd.f32 %v1592_v11, %v918_v46  ;;  %v1048_v10 = vadd.f32 %v1592_v11, %v919_v47 }
  0xf8   : > { %v1049_v53 = vadd.f32 %v1592_v11, %v920_v41  ;;  %v1050_v49 = vadd.f32 %v1592_v11, %v921_v48  ;;  %v1051_v57 = vadd.f32 %v1592_v11, %v922_v58  ;;  %v1052_v59 = vadd.f32 %v1592_v11, %v923_v52 }
  0xf9   : > { %1173 = vst [vmem:[%s1636_s23 + $0x3c0] sm:$0xff] %v1045_v50 }
  0xfa   : > { %1174 = vst [vmem:[%s1636_s23 + $0x3c8] sm:$0xff] %v1046_v51 }
  0xfb   : > { %1175 = vst [vmem:[%s1636_s23 + $0x3d0] sm:$0xff] %v1047_v45 }
  0xfc   : > { %1176 = vst [vmem:[%s1636_s23 + $0x3d8] sm:$0xff] %v1048_v10 }
  0xfd   : > { %1177 = vst [vmem:[%s1636_s23 + $0x3e0] sm:$0xff] %v1049_v53 }
  0xfe   : > { %1178 = vst [vmem:[%s1636_s23 + $0x3e8] sm:$0xff] %v1050_v49 }
  0xff   : > { %1179 = vst [vmem:[%s1636_s23 + $0x3f0] sm:$0xff] %v1051_v57 }
 0x100   : > { %1180 = vst [vmem:[%s1636_s23 + $0x3f8] sm:$0xff] %v1052_v59 }
 0x101   : > { %1414 = shalt.err (!%p1411_p4)
}
 0x102   : > { %s1460_s27 = smov 1024   ;;  %s1461_s30 = smov 64  }
 0x103   : > { %1296 = dma.vmem_to_hbm [thread:$0]  (%p1530_p11), %s1196_s10, 16384, %s1198_s11, %s1182_s12, %s1460_s27, %s1460_s27, %s1461_s30  }
 0x104 PF: > { %s1212_s3 = sand.u32 1, %s1443_s13   ;;  %p2400_p7 = scmp.ge.s32.totalorder %s1455_s16, 2 }
 0x105   : > { %s1213_s4 = scalar_lea.sflag [#allocation6], %s1212_s3 }
 0x106   : > { %p1303_p5 = pnand %p2400_p7, %p1534_p12 }
 0x108   : > { %p1304_p8 = pneg %p1303_p5 }
 0x10a   : > { %1438 = dma.done.wait (%p1304_p8), %s1213_s4, 16384  }
 0x10b   : > { %1440 = vsyncadd (%p1304_p8), %s1213_s4, 4294950912  ;;  %p23_p10 = scmp.ge.s32.totalorder %s1505_s18, 4   ;;  %s2401_s13 = smov %s1447_s14 }
 0x10c   : > { %s2402_s14 = smov %s1451_s15  ;;  %s2403_s15 = smov %s1517_s21 }
 0x10d   : > { %s2404_s16 = smov %s1505_s18  ;;  %25 = sbr.rel (!%p23_p10) target bundleno = 11 (0xb), region = 69 }
 0x112   :  { %1219 = vsyncpa [#allocation5], 1 }
 0x113   :  { %1221 = vsyncpa [#allocation5 + $0x1], 1 }
 0x114   :  { %1222 = vsyncpa [#allocation6], 1 }
 0x115   :  { %1224 = vsyncpa [#allocation6 + $0x1], 1 }

</bundles_post_ra>
